<compile_context>
chip_gen: v7x
topology: tpu7x:2x2x1
jax: 0.10.0
libtpu: 0.0.40
codegen_flags: <defaults>
</compile_context>

<pallas_src>
import jax
import jax.numpy as jnp
from jax import lax
from jax.experimental import pallas as pl
from jax.experimental.pallas import tpu as pltpu

HIDDEN_SIZE = 64
OUTPUT_SIZE = 1


def _rnn_kernel(ids_ref, ptab_ref, w_hh_ref, w_fc_ref, b_fc_ref, *out_refs):
    """RNN recurrence (column layout) + in-kernel embedding gather + fc + softmax.

    ids_ref:  (T, 1, tn) int32  token ids, time-major, batch tile on lanes
    ptab_ref: (H, Vpad)  bf16   folded table: (E @ W_ih^T + b_ih + b_hh)^T, resident
    w_hh_ref: (H, H)     bf16   weight_hh_l0 (column layout: rec = W_hh @ h)
    w_fc_ref: (H, 1)     f32    fc.weight as a column
    b_fc_ref: (1, 1)     f32    fc.bias
    out_refs: out (1, tn) softmax output [, logits (1, tn) pre-softmax, optional]
    """
    out_ref = out_refs[0]
    logits_ref = out_refs[1] if len(out_refs) > 1 else None

    T, _, tn = ids_ref.shape
    H, Vpad = ptab_ref.shape

    ptab = ptab_ref[...]                     # (H, Vpad) bf16, loaded once
    w_hh = w_hh_ref[...]                     # (H, H)    bf16
    w_fc = w_fc_ref[...]                     # (H, 1)    f32

    # Hoisted: vocab-index iota for the per-step one-hot gather (not re-broadcast
    # per iteration).
    vocab_iota = lax.broadcasted_iota(jnp.int32, (Vpad, tn), 0)

    def x_of(t):
        ids_t = ids_ref[t]                                           # (1, tn) int32
        onehot = jnp.where(vocab_iota == ids_t, 1.0, 0.0).astype(jnp.bfloat16)
        # Gather-as-matmul: selects column ids_t[n] of the folded table for each
        # lane n.  Independent of h -> overlaps with the serial recurrence.
        return jnp.dot(ptab, onehot, preferred_element_type=jnp.float32)  # (H, tn)

    def step(t, h):
        # Serial chain: bf16 MXU matmul with f32 accumulate, then f32 add + tanh.
        rec = jnp.dot(w_hh, h.astype(jnp.bfloat16),
                      preferred_element_type=jnp.float32)             # (H, tn)
        return jnp.tanh(x_of(t) + rec)

    h = lax.fori_loop(0, T, step, jnp.zeros((H, tn), jnp.float32),
                      unroll=min(T, 8))

    # fc as a VPU multiply + sublane reduction (no tiny MXU matmul); lane-dense.
    logits = jnp.sum(h * w_fc, axis=0, keepdims=True) + b_fc_ref[...]  # (1, tn)

    # softmax along the original dim=1 (size-1 feature axis == axis 0 here):
    # identically 1.0; computed explicitly for fidelity with the module.
    m = jnp.max(logits, axis=0, keepdims=True)
    e = jnp.exp(logits - m)
    out_ref[...] = e / jnp.sum(e, axis=0, keepdims=True)
    if logits_ref is not None:
        logits_ref[...] = logits


def rnn_binary_classification_forward(inputs, embedding_matrix,
                                      w_ih, w_hh, b_ih, b_hh, w_fc, b_fc,
                                      *, return_logits=False):
    """inputs: (N, T) int32 token ids. Returns (N, 1) float32 softmax output."""
    N, T = inputs.shape
    H = w_hh.shape[0]
    V = embedding_matrix.shape[0]

    # Fold the input projection + both biases into the (tiny) vocab table once:
    #   P[v] = E[v] @ W_ih^T + (b_ih + b_hh)      -> stored transposed as (H, Vpad)
    # (padding_idx=0 zeroing is overwritten by `embedding.weight.data = ...` in
    #  the PyTorch module, so row 0 needs no special handling.)
    proj = (embedding_matrix.astype(jnp.float32) @ w_ih.T.astype(jnp.float32)
            + (b_ih + b_hh).astype(jnp.float32)[None, :])              # (V, H)
    v_pad = ((V + 127) // 128) * 128
    ptab = jnp.zeros((H, v_pad), jnp.bfloat16)
    ptab = ptab.at[:, :V].set(proj.T.astype(jnp.bfloat16))             # (H, Vpad) bf16

    # Only the int32 ids are streamed; time-major, batch on the lane axis.
    ids_tm = inputs.T.astype(jnp.int32).reshape(T, 1, N)                # (T, 1, N)

    w_hh_b = w_hh.astype(jnp.bfloat16)                                  # rec = W_hh @ h
    w_fc_col = w_fc.reshape(H, 1).astype(jnp.float32)                   # (H, 1)
    b_fc_2d = b_fc.reshape(1, OUTPUT_SIZE).astype(jnp.float32)          # (1, 1)

    # Batch tile on the lane axis: 256 amortizes per-step fixed MXU/EUP latency
    # without spilling the (H, tn) f32 carry; N >= 512 then gives >= 2 programs
    # (shards across v7x's two TensorCores).  Small / ragged batches fall back
    # to one full-extent block (always layout-legal).
    if N > 256 and N % 256 == 0:
        tn = 256
    elif N > 128 and N % 128 == 0:
        tn = 128
    else:
        tn = N
        # TODO(synk): pad/mask large ragged batches instead of one full-extent block.
    grid = (N // tn,)

    out_shapes = [jax.ShapeDtypeStruct((1, N), jnp.float32)]
    out_specs = [pl.BlockSpec((1, tn), lambda i: (0, i))]
    if return_logits:
        out_shapes.append(jax.ShapeDtypeStruct((1, N), jnp.float32))
        out_specs.append(pl.BlockSpec((1, tn), lambda i: (0, i)))

    results = pl.pallas_call(
        _rnn_kernel,
        out_shape=tuple(out_shapes),
        grid=grid,
        in_specs=[
            pl.BlockSpec((T, 1, tn), lambda i: (0, 0, i)),      # token ids (streamed)
            pl.BlockSpec((H, v_pad), lambda i: (0, 0)),         # folded vocab table (resident)
            pl.BlockSpec((H, H), lambda i: (0, 0)),             # W_hh
            pl.BlockSpec((H, 1), lambda i: (0, 0)),             # fc weight column
            pl.BlockSpec((1, OUTPUT_SIZE), lambda i: (0, 0)),   # fc bias
        ],
        out_specs=tuple(out_specs),
        compiler_params=pltpu.CompilerParams(
            dimension_semantics=("parallel",)),
    )(ids_tm, ptab, w_hh_b, w_fc_col, b_fc_2d)

    out = results[0].reshape(N, OUTPUT_SIZE)
    if return_logits:
        return out, results[1].reshape(N, OUTPUT_SIZE)
    return out


if __name__ == "__main__":
    # Small deterministic setup consistent with the module.
    VOCAB = 50
    EMBED_DIM = 32
    N, T, H = 8, 8, HIDDEN_SIZE

    key = jax.random.PRNGKey(0)
    k_emb, k_ih, k_hh, k_bih, k_bhh, k_fcw, k_fcb, k_in = jax.random.split(key, 8)

    embedding_matrix = 0.1 * jax.random.normal(k_emb, (VOCAB, EMBED_DIM), jnp.float32)
    w_ih = 0.1 * jax.random.normal(k_ih, (H, EMBED_DIM), jnp.float32)     # weight_ih_l0
    w_hh = 0.1 * jax.random.normal(k_hh, (H, H), jnp.float32)             # weight_hh_l0
    b_ih = 0.1 * jax.random.normal(k_bih, (H,), jnp.float32)
    b_hh = 0.1 * jax.random.normal(k_bhh, (H,), jnp.float32)
    w_fc = 0.1 * jax.random.normal(k_fcw, (OUTPUT_SIZE, H), jnp.float32)  # fc.weight
    b_fc = 0.1 * jax.random.normal(k_fcb, (OUTPUT_SIZE,), jnp.float32)    # fc.bias

    inputs = jax.random.randint(k_in, (N, T), 0, VOCAB, dtype=jnp.int32)

    out, logits = rnn_binary_classification_forward(
        inputs, embedding_matrix, w_ih, w_hh, b_ih, b_hh, w_fc, b_fc,
        return_logits=True)
    out = jax.block_until_ready(out)
    logits = jax.block_until_ready(logits)

    # Pure-JAX f32 reference of the original module math.
    emb = jnp.take(embedding_matrix, inputs, axis=0)
    h = jnp.zeros((N, H), jnp.float32)
    for t in range(T):
        h = jnp.tanh(emb[:, t, :] @ w_ih.T + b_ih + h @ w_hh.T + b_hh)
    logits_ref = h @ w_fc.T + b_fc
    ref = jax.nn.softmax(logits_ref, axis=1)

    assert out.shape == (N, OUTPUT_SIZE)
    # Module output: softmax over a size-1 axis -> identically 1.0.
    assert jnp.allclose(out, ref, atol=1e-6, rtol=1e-6)
    # Stronger check: pre-softmax logits (bf16 table + bf16 recurrence -> loose tol).
    assert jnp.allclose(logits, logits_ref, atol=2e-2, rtol=2e-2)
    print("KERNEL_OK")
</pallas_src>

<mosaic_0001>
module attributes {stable_mosaic.version = 11 : i64} {
  func.func @_rnn_kernel(%arg0: i32, %arg1: memref<8x1x8xi32, #tpu.memory_space<vmem>>, %arg2: memref<64x128xbf16, #tpu.memory_space<vmem>>, %arg3: memref<64x64xbf16, #tpu.memory_space<vmem>>, %arg4: memref<64x1xf32, #tpu.memory_space<vmem>>, %arg5: memref<1x1xf32, #tpu.memory_space<vmem>>, %arg6: memref<1x8xf32, #tpu.memory_space<vmem>>, %arg7: memref<1x8xf32, #tpu.memory_space<vmem>>) attributes {dimension_semantics = [#tpu.dimension_semantics<parallel>], iteration_bounds = array<i64: 1>, scalar_prefetch = 0 : i64, scratch_operands = 0 : i64, tpu.core_type = #tpu.core_type<tc>, window_params = [{transform_indices = @transform_0, window_bounds = array<i64: 8, 1, 8>}, {pipeline_mode = #tpu.pipeline_mode<synchronous>, transform_indices = @transform_1, window_bounds = array<i64: 64, 128>}, {pipeline_mode = #tpu.pipeline_mode<synchronous>, transform_indices = @transform_2, window_bounds = array<i64: 64, 64>}, {pipeline_mode = #tpu.pipeline_mode<synchronous>, transform_indices = @transform_3, window_bounds = array<i64: 64, 1>}, {pipeline_mode = #tpu.pipeline_mode<synchronous>, transform_indices = @transform_4, window_bounds = array<i64: 1, 1>}, {transform_indices = @transform_5, window_bounds = array<i64: 1, 8>}, {transform_indices = @transform_6, window_bounds = array<i64: 1, 8>}]} {
    %c0 = arith.constant 0 : index
    %c0_0 = arith.constant 0 : index
    %0 = vector.load %arg2[%c0, %c0_0] : memref<64x128xbf16, #tpu.memory_space<vmem>>, vector<64x128xbf16>
    %c0_1 = arith.constant 0 : index
    %c0_2 = arith.constant 0 : index
    %1 = vector.load %arg3[%c0_1, %c0_2] : memref<64x64xbf16, #tpu.memory_space<vmem>>, vector<64x64xbf16>
    %c0_3 = arith.constant 0 : index
    %c0_4 = arith.constant 0 : index
    %2 = vector.load %arg4[%c0_3, %c0_4] : memref<64x1xf32, #tpu.memory_space<vmem>>, vector<64x1xf32>
    %3 = tpu.iota {dimensions = array<i32: 0>} : vector<128x8xi32>
    %cst = arith.constant 0.000000e+00 : f32
    %4 = vector.broadcast %cst : f32 to vector<64x8xf32>
    %c0_i32 = arith.constant 0 : i32
    %5 = arith.truncf %4 : vector<64x8xf32> to vector<64x8xbf16>
    %cst_5 = arith.constant dense<0.000000e+00> : vector<64x8xf32>
    %6 = tpu.matmul %1, %5, %cst_5 {dimension_numbers = #tpu.dot_dimension_numbers<[1], [0], [0], [1], [0, 0, 1, 1], [], []>} : vector<64x64xbf16>, vector<64x8xbf16>, vector<64x8xf32> -> vector<64x8xf32>
    %7 = arith.index_cast %c0_i32 : i32 to index
    %c0_6 = arith.constant 0 : index
    %c0_7 = arith.constant 0 : index
    %8 = vector.load %arg1[%7, %c0_6, %c0_7] : memref<8x1x8xi32, #tpu.memory_space<vmem>>, vector<1x1x8xi32>
    %9 = vector.shape_cast %8 : vector<1x1x8xi32> to vector<1x8xi32>
    %10 = vector.broadcast %9 : vector<1x8xi32> to vector<128x8xi32>
    %11 = arith.cmpi eq, %3, %10 : vector<128x8xi32>
    %cst_8 = arith.constant 1.000000e+00 : f32
    %cst_9 = arith.constant 0.000000e+00 : f32
    %12 = vector.broadcast %cst_8 : f32 to vector<128x8xf32>
    %13 = vector.broadcast %cst_9 : f32 to vector<128x8xf32>
    %14 = arith.select %11, %12, %13 : vector<128x8xi1>, vector<128x8xf32>
    %15 = arith.truncf %14 : vector<128x8xf32> to vector<128x8xbf16>
    %cst_10 = arith.constant dense<0.000000e+00> : vector<64x8xf32>
    %16 = tpu.matmul %0, %15, %cst_10 {dimension_numbers = #tpu.dot_dimension_numbers<[1], [0], [0], [1], [0, 0, 1, 1], [], []>} : vector<64x128xbf16>, vector<128x8xbf16>, vector<64x8xf32> -> vector<64x8xf32>
    %17 = arith.addf %16, %6 : vector<64x8xf32>
    %18 = math.tanh %17 : vector<64x8xf32>
    %c1_i32 = arith.constant 1 : i32
    %19 = arith.truncf %18 : vector<64x8xf32> to vector<64x8xbf16>
    %cst_11 = arith.constant dense<0.000000e+00> : vector<64x8xf32>
    %20 = tpu.matmul %1, %19, %cst_11 {dimension_numbers = #tpu.dot_dimension_numbers<[1], [0], [0], [1], [0, 0, 1, 1], [], []>} : vector<64x64xbf16>, vector<64x8xbf16>, vector<64x8xf32> -> vector<64x8xf32>
    %21 = arith.index_cast %c1_i32 : i32 to index
    %c0_12 = arith.constant 0 : index
    %c0_13 = arith.constant 0 : index
    %22 = vector.load %arg1[%21, %c0_12, %c0_13] : memref<8x1x8xi32, #tpu.memory_space<vmem>>, vector<1x1x8xi32>
    %23 = vector.shape_cast %22 : vector<1x1x8xi32> to vector<1x8xi32>
    %24 = vector.broadcast %23 : vector<1x8xi32> to vector<128x8xi32>
    %25 = arith.cmpi eq, %3, %24 : vector<128x8xi32>
    %cst_14 = arith.constant 1.000000e+00 : f32
    %cst_15 = arith.constant 0.000000e+00 : f32
    %26 = vector.broadcast %cst_14 : f32 to vector<128x8xf32>
    %27 = vector.broadcast %cst_15 : f32 to vector<128x8xf32>
    %28 = arith.select %25, %26, %27 : vector<128x8xi1>, vector<128x8xf32>
    %29 = arith.truncf %28 : vector<128x8xf32> to vector<128x8xbf16>
    %cst_16 = arith.constant dense<0.000000e+00> : vector<64x8xf32>
    %30 = tpu.matmul %0, %29, %cst_16 {dimension_numbers = #tpu.dot_dimension_numbers<[1], [0], [0], [1], [0, 0, 1, 1], [], []>} : vector<64x128xbf16>, vector<128x8xbf16>, vector<64x8xf32> -> vector<64x8xf32>
    %31 = arith.addf %30, %20 : vector<64x8xf32>
    %32 = math.tanh %31 : vector<64x8xf32>
    %c2_i32 = arith.constant 2 : i32
    %33 = arith.truncf %32 : vector<64x8xf32> to vector<64x8xbf16>
    %cst_17 = arith.constant dense<0.000000e+00> : vector<64x8xf32>
    %34 = tpu.matmul %1, %33, %cst_17 {dimension_numbers = #tpu.dot_dimension_numbers<[1], [0], [0], [1], [0, 0, 1, 1], [], []>} : vector<64x64xbf16>, vector<64x8xbf16>, vector<64x8xf32> -> vector<64x8xf32>
    %35 = arith.index_cast %c2_i32 : i32 to index
    %c0_18 = arith.constant 0 : index
    %c0_19 = arith.constant 0 : index
    %36 = vector.load %arg1[%35, %c0_18, %c0_19] : memref<8x1x8xi32, #tpu.memory_space<vmem>>, vector<1x1x8xi32>
    %37 = vector.shape_cast %36 : vector<1x1x8xi32> to vector<1x8xi32>
    %38 = vector.broadcast %37 : vector<1x8xi32> to vector<128x8xi32>
    %39 = arith.cmpi eq, %3, %38 : vector<128x8xi32>
    %cst_20 = arith.constant 1.000000e+00 : f32
    %cst_21 = arith.constant 0.000000e+00 : f32
    %40 = vector.broadcast %cst_20 : f32 to vector<128x8xf32>
    %41 = vector.broadcast %cst_21 : f32 to vector<128x8xf32>
    %42 = arith.select %39, %40, %41 : vector<128x8xi1>, vector<128x8xf32>
    %43 = arith.truncf %42 : vector<128x8xf32> to vector<128x8xbf16>
    %cst_22 = arith.constant dense<0.000000e+00> : vector<64x8xf32>
    %44 = tpu.matmul %0, %43, %cst_22 {dimension_numbers = #tpu.dot_dimension_numbers<[1], [0], [0], [1], [0, 0, 1, 1], [], []>} : vector<64x128xbf16>, vector<128x8xbf16>, vector<64x8xf32> -> vector<64x8xf32>
    %45 = arith.addf %44, %34 : vector<64x8xf32>
    %46 = math.tanh %45 : vector<64x8xf32>
    %c3_i32 = arith.constant 3 : i32
    %47 = arith.truncf %46 : vector<64x8xf32> to vector<64x8xbf16>
    %cst_23 = arith.constant dense<0.000000e+00> : vector<64x8xf32>
    %48 = tpu.matmul %1, %47, %cst_23 {dimension_numbers = #tpu.dot_dimension_numbers<[1], [0], [0], [1], [0, 0, 1, 1], [], []>} : vector<64x64xbf16>, vector<64x8xbf16>, vector<64x8xf32> -> vector<64x8xf32>
    %49 = arith.index_cast %c3_i32 : i32 to index
    %c0_24 = arith.constant 0 : index
    %c0_25 = arith.constant 0 : index
    %50 = vector.load %arg1[%49, %c0_24, %c0_25] : memref<8x1x8xi32, #tpu.memory_space<vmem>>, vector<1x1x8xi32>
    %51 = vector.shape_cast %50 : vector<1x1x8xi32> to vector<1x8xi32>
    %52 = vector.broadcast %51 : vector<1x8xi32> to vector<128x8xi32>
    %53 = arith.cmpi eq, %3, %52 : vector<128x8xi32>
    %cst_26 = arith.constant 1.000000e+00 : f32
    %cst_27 = arith.constant 0.000000e+00 : f32
    %54 = vector.broadcast %cst_26 : f32 to vector<128x8xf32>
    %55 = vector.broadcast %cst_27 : f32 to vector<128x8xf32>
    %56 = arith.select %53, %54, %55 : vector<128x8xi1>, vector<128x8xf32>
    %57 = arith.truncf %56 : vector<128x8xf32> to vector<128x8xbf16>
    %cst_28 = arith.constant dense<0.000000e+00> : vector<64x8xf32>
    %58 = tpu.matmul %0, %57, %cst_28 {dimension_numbers = #tpu.dot_dimension_numbers<[1], [0], [0], [1], [0, 0, 1, 1], [], []>} : vector<64x128xbf16>, vector<128x8xbf16>, vector<64x8xf32> -> vector<64x8xf32>
    %59 = arith.addf %58, %48 : vector<64x8xf32>
    %60 = math.tanh %59 : vector<64x8xf32>
    %c4_i32 = arith.constant 4 : i32
    %61 = arith.truncf %60 : vector<64x8xf32> to vector<64x8xbf16>
    %cst_29 = arith.constant dense<0.000000e+00> : vector<64x8xf32>
    %62 = tpu.matmul %1, %61, %cst_29 {dimension_numbers = #tpu.dot_dimension_numbers<[1], [0], [0], [1], [0, 0, 1, 1], [], []>} : vector<64x64xbf16>, vector<64x8xbf16>, vector<64x8xf32> -> vector<64x8xf32>
    %63 = arith.index_cast %c4_i32 : i32 to index
    %c0_30 = arith.constant 0 : index
    %c0_31 = arith.constant 0 : index
    %64 = vector.load %arg1[%63, %c0_30, %c0_31] : memref<8x1x8xi32, #tpu.memory_space<vmem>>, vector<1x1x8xi32>
    %65 = vector.shape_cast %64 : vector<1x1x8xi32> to vector<1x8xi32>
    %66 = vector.broadcast %65 : vector<1x8xi32> to vector<128x8xi32>
    %67 = arith.cmpi eq, %3, %66 : vector<128x8xi32>
    %cst_32 = arith.constant 1.000000e+00 : f32
    %cst_33 = arith.constant 0.000000e+00 : f32
    %68 = vector.broadcast %cst_32 : f32 to vector<128x8xf32>
    %69 = vector.broadcast %cst_33 : f32 to vector<128x8xf32>
    %70 = arith.select %67, %68, %69 : vector<128x8xi1>, vector<128x8xf32>
    %71 = arith.truncf %70 : vector<128x8xf32> to vector<128x8xbf16>
    %cst_34 = arith.constant dense<0.000000e+00> : vector<64x8xf32>
    %72 = tpu.matmul %0, %71, %cst_34 {dimension_numbers = #tpu.dot_dimension_numbers<[1], [0], [0], [1], [0, 0, 1, 1], [], []>} : vector<64x128xbf16>, vector<128x8xbf16>, vector<64x8xf32> -> vector<64x8xf32>
    %73 = arith.addf %72, %62 : vector<64x8xf32>
    %74 = math.tanh %73 : vector<64x8xf32>
    %c5_i32 = arith.constant 5 : i32
    %75 = arith.truncf %74 : vector<64x8xf32> to vector<64x8xbf16>
    %cst_35 = arith.constant dense<0.000000e+00> : vector<64x8xf32>
    %76 = tpu.matmul %1, %75, %cst_35 {dimension_numbers = #tpu.dot_dimension_numbers<[1], [0], [0], [1], [0, 0, 1, 1], [], []>} : vector<64x64xbf16>, vector<64x8xbf16>, vector<64x8xf32> -> vector<64x8xf32>
    %77 = arith.index_cast %c5_i32 : i32 to index
    %c0_36 = arith.constant 0 : index
    %c0_37 = arith.constant 0 : index
    %78 = vector.load %arg1[%77, %c0_36, %c0_37] : memref<8x1x8xi32, #tpu.memory_space<vmem>>, vector<1x1x8xi32>
    %79 = vector.shape_cast %78 : vector<1x1x8xi32> to vector<1x8xi32>
    %80 = vector.broadcast %79 : vector<1x8xi32> to vector<128x8xi32>
    %81 = arith.cmpi eq, %3, %80 : vector<128x8xi32>
    %cst_38 = arith.constant 1.000000e+00 : f32
    %cst_39 = arith.constant 0.000000e+00 : f32
    %82 = vector.broadcast %cst_38 : f32 to vector<128x8xf32>
    %83 = vector.broadcast %cst_39 : f32 to vector<128x8xf32>
    %84 = arith.select %81, %82, %83 : vector<128x8xi1>, vector<128x8xf32>
    %85 = arith.truncf %84 : vector<128x8xf32> to vector<128x8xbf16>
    %cst_40 = arith.constant dense<0.000000e+00> : vector<64x8xf32>
    %86 = tpu.matmul %0, %85, %cst_40 {dimension_numbers = #tpu.dot_dimension_numbers<[1], [0], [0], [1], [0, 0, 1, 1], [], []>} : vector<64x128xbf16>, vector<128x8xbf16>, vector<64x8xf32> -> vector<64x8xf32>
    %87 = arith.addf %86, %76 : vector<64x8xf32>
    %88 = math.tanh %87 : vector<64x8xf32>
    %c6_i32 = arith.constant 6 : i32
    %89 = arith.truncf %88 : vector<64x8xf32> to vector<64x8xbf16>
    %cst_41 = arith.constant dense<0.000000e+00> : vector<64x8xf32>
    %90 = tpu.matmul %1, %89, %cst_41 {dimension_numbers = #tpu.dot_dimension_numbers<[1], [0], [0], [1], [0, 0, 1, 1], [], []>} : vector<64x64xbf16>, vector<64x8xbf16>, vector<64x8xf32> -> vector<64x8xf32>
    %91 = arith.index_cast %c6_i32 : i32 to index
    %c0_42 = arith.constant 0 : index
    %c0_43 = arith.constant 0 : index
    %92 = vector.load %arg1[%91, %c0_42, %c0_43] : memref<8x1x8xi32, #tpu.memory_space<vmem>>, vector<1x1x8xi32>
    %93 = vector.shape_cast %92 : vector<1x1x8xi32> to vector<1x8xi32>
    %94 = vector.broadcast %93 : vector<1x8xi32> to vector<128x8xi32>
    %95 = arith.cmpi eq, %3, %94 : vector<128x8xi32>
    %cst_44 = arith.constant 1.000000e+00 : f32
    %cst_45 = arith.constant 0.000000e+00 : f32
    %96 = vector.broadcast %cst_44 : f32 to vector<128x8xf32>
    %97 = vector.broadcast %cst_45 : f32 to vector<128x8xf32>
    %98 = arith.select %95, %96, %97 : vector<128x8xi1>, vector<128x8xf32>
    %99 = arith.truncf %98 : vector<128x8xf32> to vector<128x8xbf16>
    %cst_46 = arith.constant dense<0.000000e+00> : vector<64x8xf32>
    %100 = tpu.matmul %0, %99, %cst_46 {dimension_numbers = #tpu.dot_dimension_numbers<[1], [0], [0], [1], [0, 0, 1, 1], [], []>} : vector<64x128xbf16>, vector<128x8xbf16>, vector<64x8xf32> -> vector<64x8xf32>
    %101 = arith.addf %100, %90 : vector<64x8xf32>
    %102 = math.tanh %101 : vector<64x8xf32>
    %c7_i32 = arith.constant 7 : i32
    %103 = arith.truncf %102 : vector<64x8xf32> to vector<64x8xbf16>
    %cst_47 = arith.constant dense<0.000000e+00> : vector<64x8xf32>
    %104 = tpu.matmul %1, %103, %cst_47 {dimension_numbers = #tpu.dot_dimension_numbers<[1], [0], [0], [1], [0, 0, 1, 1], [], []>} : vector<64x64xbf16>, vector<64x8xbf16>, vector<64x8xf32> -> vector<64x8xf32>
    %105 = arith.index_cast %c7_i32 : i32 to index
    %c0_48 = arith.constant 0 : index
    %c0_49 = arith.constant 0 : index
    %106 = vector.load %arg1[%105, %c0_48, %c0_49] : memref<8x1x8xi32, #tpu.memory_space<vmem>>, vector<1x1x8xi32>
    %107 = vector.shape_cast %106 : vector<1x1x8xi32> to vector<1x8xi32>
    %108 = vector.broadcast %107 : vector<1x8xi32> to vector<128x8xi32>
    %109 = arith.cmpi eq, %3, %108 : vector<128x8xi32>
    %cst_50 = arith.constant 1.000000e+00 : f32
    %cst_51 = arith.constant 0.000000e+00 : f32
    %110 = vector.broadcast %cst_50 : f32 to vector<128x8xf32>
    %111 = vector.broadcast %cst_51 : f32 to vector<128x8xf32>
    %112 = arith.select %109, %110, %111 : vector<128x8xi1>, vector<128x8xf32>
    %113 = arith.truncf %112 : vector<128x8xf32> to vector<128x8xbf16>
    %cst_52 = arith.constant dense<0.000000e+00> : vector<64x8xf32>
    %114 = tpu.matmul %0, %113, %cst_52 {dimension_numbers = #tpu.dot_dimension_numbers<[1], [0], [0], [1], [0, 0, 1, 1], [], []>} : vector<64x128xbf16>, vector<128x8xbf16>, vector<64x8xf32> -> vector<64x8xf32>
    %115 = arith.addf %114, %104 : vector<64x8xf32>
    %116 = math.tanh %115 : vector<64x8xf32>
    %c8_i32 = arith.constant 8 : i32
    %117 = vector.broadcast %2 : vector<64x1xf32> to vector<64x8xf32>
    %118 = arith.mulf %116, %117 : vector<64x8xf32>
    %cst_53 = arith.constant dense<0.000000e+00> : vector<8xf32>
    %119 = vector.multi_reduction <add>, %118, %cst_53 [0] : vector<64x8xf32> to vector<8xf32>
    %120 = vector.shape_cast %119 : vector<8xf32> to vector<1x8xf32>
    %c0_54 = arith.constant 0 : index
    %c0_55 = arith.constant 0 : index
    %121 = vector.load %arg5[%c0_54, %c0_55] : memref<1x1xf32, #tpu.memory_space<vmem>>, vector<1x1xf32>
    %122 = vector.broadcast %121 : vector<1x1xf32> to vector<1x8xf32>
    %123 = arith.addf %120, %122 : vector<1x8xf32>
    %cst_56 = arith.constant dense<0xFF800000> : vector<8xf32>
    %124 = vector.multi_reduction <maximumf>, %123, %cst_56 [0] : vector<1x8xf32> to vector<8xf32>
    %125 = vector.shape_cast %124 : vector<8xf32> to vector<1x8xf32>
    %126 = arith.subf %123, %125 : vector<1x8xf32>
    %127 = math.exp %126 : vector<1x8xf32>
    %cst_57 = arith.constant dense<0.000000e+00> : vector<8xf32>
    %128 = vector.multi_reduction <add>, %127, %cst_57 [0] : vector<1x8xf32> to vector<8xf32>
    %129 = vector.shape_cast %128 : vector<8xf32> to vector<1x8xf32>
    %130 = arith.divf %127, %129 : vector<1x8xf32>
    %c0_58 = arith.constant 0 : index
    %c0_59 = arith.constant 0 : index
    %131 = vector.load %arg6[%c0_58, %c0_59] : memref<1x8xf32, #tpu.memory_space<vmem>>, vector<1x8xf32>
    tpu.vector_store %arg6[%c0_58, %c0_59], %130 {strides = array<i32>} : memref<1x8xf32, #tpu.memory_space<vmem>>, vector<1x8xf32>,
    %c0_60 = arith.constant 0 : index
    %c0_61 = arith.constant 0 : index
    %132 = vector.load %arg7[%c0_60, %c0_61] : memref<1x8xf32, #tpu.memory_space<vmem>>, vector<1x8xf32>
    tpu.vector_store %arg7[%c0_60, %c0_61], %123 {strides = array<i32>} : memref<1x8xf32, #tpu.memory_space<vmem>>, vector<1x8xf32>,
    return
  }
  func.func @transform_0(%arg0: i32) -> (i32, i32, i32) {
    %c0_i32 = arith.constant 0 : i32
    %c0_i32_0 = arith.constant 0 : i32
    %c0_i32_1 = arith.constant 0 : i32
    return %c0_i32, %c0_i32_0, %arg0 : i32, i32, i32
  }
  func.func @transform_1(%arg0: i32) -> (i32, i32) {
    %c0_i32 = arith.constant 0 : i32
    %c0_i32_0 = arith.constant 0 : i32
    %c0_i32_1 = arith.constant 0 : i32
    return %c0_i32, %c0_i32_0 : i32, i32
  }
  func.func @transform_2(%arg0: i32) -> (i32, i32) {
    %c0_i32 = arith.constant 0 : i32
    %c0_i32_0 = arith.constant 0 : i32
    %c0_i32_1 = arith.constant 0 : i32
    return %c0_i32, %c0_i32_0 : i32, i32
  }
  func.func @transform_3(%arg0: i32) -> (i32, i32) {
    %c0_i32 = arith.constant 0 : i32
    %c0_i32_0 = arith.constant 0 : i32
    %c0_i32_1 = arith.constant 0 : i32
    return %c0_i32, %c0_i32_0 : i32, i32
  }
  func.func @transform_4(%arg0: i32) -> (i32, i32) {
    %c0_i32 = arith.constant 0 : i32
    %c0_i32_0 = arith.constant 0 : i32
    %c0_i32_1 = arith.constant 0 : i32
    return %c0_i32, %c0_i32_0 : i32, i32
  }
  func.func @transform_5(%arg0: i32) -> (i32, i32) {
    %c0_i32 = arith.constant 0 : i32
    %c0_i32_0 = arith.constant 0 : i32
    return %c0_i32, %arg0 : i32, i32
  }
  func.func @transform_6(%arg0: i32) -> (i32, i32) {
    %c0_i32 = arith.constant 0 : i32
    %c0_i32_0 = arith.constant 0 : i32
    return %c0_i32, %arg0 : i32, i32
  }
}

</mosaic_0001>

<bundles_post_ra>
// kernel: tpu_custom_call.1
= control target key start
LH: loop header
LB: loop body
LE: loop exit
PB: predicated region body
PF: predicated region fallthrough
CT: control target
= control target key end

     0   :  { %s3283_s0 = inlined_call_operand.hbm [shape: s32[8,1,8], index: 0, kind: input, shape index: {}]   ;;  %s3284_s1 = inlined_call_operand.vmem [shape: bf16[64,128], index: 1, kind: input, shape index: {}]   ;;  %s3285_s2 = inlined_call_operand.vmem [shape: bf16[64,64], index: 2, kind: input, shape index: {}]   ;;  %s3286_s3 = inlined_call_operand.vmem [shape: f32[64,1], index: 3, kind: input, shape index: {}]   ;;  %s3287_s4 = inlined_call_operand.<no memory space> [shape: f32[1,1], index: 4, kind: input, shape index: {}]   ;;  %s3288_s5 = inlined_call_operand.hbm [shape: f32[1,8], index: 5, kind: output, shape index: {0}]   ;;  %s3289_s6 = inlined_call_operand.hbm [shape: f32[1,8], index: 6, kind: output, shape index: {1}]  }
   0x1   :  { %v12_v0 = vstv %s3287_s4 }
   0x2   :  { %13 = vst [vmem:[#allocation2] sm:$0x1] %v12_v0 }
   0x3   :  { %14 = vsyncpa [#allocation4], 0 }
   0x4   :  { %15 = vsyncpa [#allocation5], 0 }
   0x5   :  { %16 = vsyncpa [#allocation8], 0  ;;  %s2696_s23 = smov [#allocation3]   ;;  %s2624_s27 = scalar_lea.hbm %s3283_s0, 128 }
   0x6   :  { %s22_s24 = sshll.u32 %s2696_s23, 4  ;;  %p2625_p0 = scmp.ne.s32.totalorder %s3283_s0, %s2624_s27  ;;  %s23_s24 = int_to_ptr.vmem [resolvable:$true] %s22_s24 }
   0x7   :  { %p2628_p1 = scmp.lt.u32.totalorder %s2624_s27, %s3283_s0 }
   0x9   :  { %p2630_p2 = pnand %p2628_p1, %p2625_p0 }
   0xb   :  { %2633 = shalt.err (!%p2630_p2)
}
   0xc   :  { %s2634_s4 = scalar_lea.vmem %s23_s24, 128  ;;  %p2639_p4 = scmp.lt.s32.totalorder %s23_s24, %s23_s24 }
   0xd   :  { %p2635_p3 = scmp.ne.s32.totalorder %s23_s24, %s2634_s4  ;;  %p2640_p5 = scmp.lt.s32.totalorder %s2634_s4, %s2634_s4 }
   0xf   :  { %p2641_p6 = por %p2640_p5, %p2639_p4 }
  0x11   :  { %p2642_p7 = pnand %p2641_p6, %p2635_p3 }
  0x13   :  { %2645 = shalt.err (!%p2642_p7)
}
  0x14   :  { %s2697_s8 = smov 16   ;;  %s2698_s9 = smov 1  }
  0x15   :  { %28 = dma.hbm_to_vmem [thread:$0]  %s3283_s0, 128, %s23_s24, [#allocation4], %s2697_s8, %s2697_s8, %s2698_s9  }
  0x16   :  { %2690 = dma.done.wait [#allocation4], 128  }
  0x17   :  { %2691 = vsyncadd [#allocation4], 4294967168  ;;  %v65_v1 = vlaneseq  ;;  %v2699_v2 = vmov 0   ;;  %vm102_vm0 = vcmask 523264   ;;  %v2770_v8 = vld [vmem:[%s3285_s2] sm:$0xff]   ;;  %v2782_v11 = vld [vmem:[%s3285_s2 + $0x8] sm:$0xff]  }
  0x18   :  { %2090 = vmatprep.subr.bf16.mxu0 %v2699_v2  ;;  %2475 = vset.pattern.permute.xlu0 %v2699_v2  ;;  %v1765_v10 = vld [vmem:[#allocation3] ss:$0 sm:$0xff]  ;;  %v2789_v12 = vld [vmem:[%s3285_s2 + $0x10] sm:$0xff]   ;;  %v2700_v13 = vmov 1.0|1.0   ;;  %v2819_v18 = vld [vmem:[%s3285_s2 + $0x18] sm:$0xff]  }
  0x19   :  { %2091 = vmatpush3.bf16.msra.mxu0 %v2699_v2  ;;  %v2753_v3 = vshrl.u32 %v65_v1, 7  ;;  %2476 = vset.pattern.permute.xlu1 %v2699_v2  ;;  %v2825_v19 = vld [vmem:[%s3284_s1] sm:$0xff]   ;;  %v2870_v26 = vld [vmem:[%s3284_s1 + $0x8] sm:$0xff]   ;;  %v2876_v27 = vld [vmem:[%s3284_s1 + $0x10] sm:$0xff]  }
  0x1a   :  { %2092 = vmatprep.mubr.msk.bf16.mxu0 %vm102_vm0, %v2770_v8  ;;  %2132 = vmatprep.mubr.msk.bf16.mxu1 %vm102_vm0, %v2770_v8  ;;  %v2883_v28 = vld [vmem:[%s3284_s1 + $0x18] sm:$0xff]   ;;  %v1790_v48 = vld [vmem:[#allocation3 + $0x1] ss:$0 sm:$0xff] }
  0x1b   :  { %v2756_v4 = vadd.s32 8, %v2753_v3  ;;  %v2759_v5 = vadd.s32 16, %v2753_v3  ;;  %v2762_v6 = vadd.s32 24, %v2753_v3  ;;  %v2765_v7 = vadd.s32 32, %v2753_v3 }
  0x1c   :  { %v2773_v9 = vadd.s32 40, %v2753_v3  ;;  %vm185_vm1 = vcmp.eq.s32.totalorder %v2753_v3, %v1765_v10  ;;  %2093 = vmatmul.mubr.msk.bf16.vlgmr.msra.gmra.mrb[0].mxu0 %vm102_vm0, %v2782_v11  ;;  %v2799_v14 = vadd.s32 48, %v2753_v3  ;;  %v2802_v15 = vadd.s32 56, %v2753_v3 }
  0x1d   :  { %vm186_vm2 = vcmp.eq.s32.totalorder %v2756_v4, %v1765_v10  ;;  %vm187_vm3 = vcmp.eq.s32.totalorder %v2759_v5, %v1765_v10  ;;  %vm188_vm4 = vcmp.eq.s32.totalorder %v2762_v6, %v1765_v10  ;;  %vm189_vm7 = vcmp.eq.s32.totalorder %v2765_v7, %v1765_v10  ;;  %2096 = vmatprep.mubr.msk.bf16.mxu0 %vm102_vm0, %v2789_v12 }
  0x1e   :  { %vm1770_vm5 = vmpackc.low %vm186_vm2, %vm185_vm1  ;;  %vm190_vm8 = vcmp.eq.s32.totalorder %v2773_v9, %v1765_v10  ;;  %v2809_v16 = vadd.s32 64, %v2753_v3  ;;  %vm191_vm10 = vcmp.eq.s32.totalorder %v2799_v14, %v1765_v10  ;;  %vm192_vm11 = vcmp.eq.s32.totalorder %v2802_v15, %v1765_v10 }
  0x1f   :  { %2100 = vmatprep.subr.msk.bf16.mxu0 %vm1770_vm5, %v2700_v13  ;;  %vm1772_vm6 = vmpackc.low %vm188_vm4, %vm187_vm3  ;;  %v2814_v17 = vadd.s32 72, %v2753_v3  ;;  %v2831_v20 = vadd.s32 80, %v2753_v3  ;;  %v2834_v21 = vadd.s32 88, %v2753_v3  ;;  %v2844_v22 = vadd.s32 96, %v2753_v3 }
  0x20   :  { %2101 = vmatpush3.bf16.msk.msra.mxu0 %vm1770_vm5, %v2700_v13  ;;  %vm1774_vm9 = vmpackc.low %vm190_vm8, %vm189_vm7  ;;  %vm193_vm13 = vcmp.eq.s32.totalorder %v2809_v16, %v1765_v10  ;;  %v2847_v23 = vadd.s32 104, %v2753_v3  ;;  %v2854_v24 = vadd.s32 112, %v2753_v3  ;;  %v2857_v25 = vadd.s32 120, %v2753_v3 }
  0x21   :  { %2102 = vmatprep.subr.msk.bf16.mxu0 %vm1772_vm6, %v2700_v13  ;;  %vm1776_vm12 = vmpackc.low %vm192_vm11, %vm191_vm10  ;;  %vm194_vm14 = vcmp.eq.s32.totalorder %v2814_v17, %v1765_v10  ;;  %vm195_vm1 = vcmp.eq.s32.totalorder %v2831_v20, %v1765_v10  ;;  %vm196_vm2 = vcmp.eq.s32.totalorder %v2834_v21, %v1765_v10  ;;  %vm197_vm4 = vcmp.eq.s32.totalorder %v2844_v22, %v1765_v10 }
  0x22   :  { %vm1778_vm15 = vmpackc.low %vm194_vm14, %vm193_vm13  ;;  %vm198_vm5 = vcmp.eq.s32.totalorder %v2847_v23, %v1765_v10  ;;  %vm199_vm7 = vcmp.eq.s32.totalorder %v2854_v24, %v1765_v10  ;;  %vm200_vm8 = vcmp.eq.s32.totalorder %v2857_v25, %v1765_v10  ;;  %vm397_vm10 = vcmp.eq.s32.totalorder %v2753_v3, %v1790_v48 }
  0x23   :  { %vm1780_vm3 = vmpackc.low %vm196_vm2, %vm195_vm1  ;;  %vm398_vm11 = vcmp.eq.s32.totalorder %v2756_v4, %v1790_v48  ;;  %vm399_vm13 = vcmp.eq.s32.totalorder %v2759_v5, %v1790_v48  ;;  %vm400_vm14 = vcmp.eq.s32.totalorder %v2762_v6, %v1790_v48  ;;  %vm401_vm1 = vcmp.eq.s32.totalorder %v2765_v7, %v1790_v48 }
  0x24   :  { %2103 = vmatpush3.bf16.msk.msra.mxu0 %vm1772_vm6, %v2700_v13  ;;  %vm1782_vm6 = vmpackc.low %vm198_vm5, %vm197_vm4  ;;  %vm402_vm2 = vcmp.eq.s32.totalorder %v2773_v9, %v1790_v48  ;;  %vm403_vm4 = vcmp.eq.s32.totalorder %v2799_v14, %v1790_v48  ;;  %vm404_vm5 = vcmp.eq.s32.totalorder %v2802_v15, %v1790_v48 }
  0x25   :  { %2104 = vmatprep.subr.msk.bf16.mxu0 %vm1774_vm9, %v2700_v13  ;;  %2097 = vmatmul.mubr.msk.bf16.gmra.mrb[4].mxu0 %vm102_vm0, %v2819_v18 }
  0x26   :  { %2116 = vmatprep.mubr.bf16.mxu0 %v2825_v19 }
  0x28   :  { %2105 = vmatpush3.bf16.msk.msra.mxu0 %vm1774_vm9, %v2700_v13  ;;  %vm1784_vm9 = vmpackc.low %vm200_vm8, %vm199_vm7  ;;  %vm405_vm7 = vcmp.eq.s32.totalorder %v2809_v16, %v1790_v48  ;;  %vm406_vm8 = vcmp.eq.s32.totalorder %v2814_v17, %v1790_v48 }
  0x29   :  { %2106 = vmatprep.subr.msk.bf16.mxu0 %vm1776_vm12, %v2700_v13 }
  0x2c   :  { %2107 = vmatpush3.bf16.msk.msra.mxu0 %vm1776_vm12, %v2700_v13  ;;  %vm1791_vm12 = vmpackc.low %vm398_vm11, %vm397_vm10  ;;  %vm407_vm10 = vcmp.eq.s32.totalorder %v2831_v20, %v1790_v48  ;;  %vm408_vm11 = vcmp.eq.s32.totalorder %v2834_v21, %v1790_v48 }
  0x2d   :  { %2108 = vmatprep.subr.msk.bf16.mxu0 %vm1778_vm15, %v2700_v13 }
  0x30   :  { %2109 = vmatpush3.bf16.msk.msra.mxu0 %vm1778_vm15, %v2700_v13  ;;  %vm1793_vm15 = vmpackc.low %vm400_vm14, %vm399_vm13  ;;  %vm409_vm13 = vcmp.eq.s32.totalorder %v2844_v22, %v1790_v48  ;;  %vm410_vm14 = vcmp.eq.s32.totalorder %v2847_v23, %v1790_v48 }
  0x31   :  { %2110 = vmatprep.subr.msk.bf16.mxu0 %vm1780_vm3, %v2700_v13 }
  0x34   :  { %2111 = vmatpush3.bf16.msk.msra.mxu0 %vm1780_vm3, %v2700_v13  ;;  %vm1795_vm3 = vmpackc.low %vm402_vm2, %vm401_vm1  ;;  %vm411_vm1 = vcmp.eq.s32.totalorder %v2854_v24, %v1790_v48  ;;  %vm412_vm2 = vcmp.eq.s32.totalorder %v2857_v25, %v1790_v48 }
  0x35   :  { %2112 = vmatprep.subr.msk.bf16.mxu0 %vm1782_vm6, %v2700_v13 }
  0x38   :  { %2113 = vmatpush3.bf16.msk.msra.mxu0 %vm1782_vm6, %v2700_v13  ;;  %vm1797_vm6 = vmpackc.low %vm404_vm5, %vm403_vm4 }
  0x39   :  { %2114 = vmatprep.subr.msk.bf16.mxu0 %vm1784_vm9, %v2700_v13 }
  0x3c   :  { %2115 = vmatpush3.bf16.msk.msra.mxu0 %vm1784_vm9, %v2700_v13  ;;  %vm1799_vm9 = vmpackc.low %vm406_vm8, %vm405_vm7 }
  0x3f   :  { %2117 = vmatmul.mubr.bf16.vlgmr.msra.gmra.mrb[0].mxu0 %v2870_v26 }
  0x40   :  { %2120 = vmatprep.mubr.bf16.mxu0 %v2876_v27 }
  0x47   :  { %2121 = vmatmul.mubr.bf16.gmra.mrb[4].mxu0 %v2883_v28 }
  0x48   :  { %2172 = vmatprep.mubr.msk.bf16.mxu0 %vm102_vm0, %v2770_v8 }
 0x112   :  { %v2118_v29 = vpop.f32.mrb[0].mxu0 }
 0x113   :  { %2485 = vtanh.f32 %v2118_v29  ;;  %v283_v30 = vpop.f32.mrb[1].mxu0 }
 0x114   :  { %2487 = vtanh.f32 %v283_v30  ;;  %v2119_v31 = vpop.f32.mrb[2].mxu0  ;;  %v1811_v30 = vld [vmem:[#allocation3 + $0x2] ss:$0 sm:$0xff] }
 0x115   :  { %2489 = vtanh.f32 %v2119_v31  ;;  %v286_v32 = vpop.f32.mrb[3].mxu0  ;;  %vm585_vm4 = vcmp.eq.s32.totalorder %v2753_v3, %v1811_v30  ;;  %vm586_vm5 = vcmp.eq.s32.totalorder %v2756_v4, %v1811_v30  ;;  %vm587_vm7 = vcmp.eq.s32.totalorder %v2759_v5, %v1811_v30 }
 0x116   :  { %2491 = vtanh.f32 %v286_v32  ;;  %vm588_vm8 = vcmp.eq.s32.totalorder %v2762_v6, %v1811_v30 }
 0x11a   :  { %v2122_v33 = vpop.f32.mrb[4].mxu0 }
 0x11b   :  { %2493 = vtanh.f32 %v2122_v33  ;;  %v299_v34 = vpop.f32.mrb[5].mxu0 }
 0x11c   :  { %2495 = vtanh.f32 %v299_v34  ;;  %v2123_v35 = vpop.f32.mrb[6].mxu0 }
 0x11d   :  { %v2486_v36 = vpop.eup %2485  ;;  %2497 = vtanh.f32 %v2123_v35  ;;  %v302_v37 = vpop.f32.mrb[7].mxu0 }
 0x11e   :  { %v2488_v38 = vpop.eup %2487  ;;  %2499 = vtanh.f32 %v302_v37 }
 0x11f   :  { %v2490_v39 = vpop.eup %2489 }
 0x120   :  { %v2492_v40 = vpop.eup %2491  ;;  %v323_v41 = vpack.c.bf16 %v2490_v39, %v2486_v36 }
 0x121   :  { %v322_v42 = vpack.c.bf16 %v2492_v40, %v2488_v38 }
 0x123   :  { %2124 = vmatprep.subr.bf16.mxu1 %v322_v42 }
 0x124   :  { %2125 = vmatpush3.bf16.msra.mxu1 %v322_v42 }
 0x125   :  { %v2494_v43 = vpop.eup %2493  ;;  %2126 = vmatprep.subr.bf16.mxu1 %v323_v41 }
 0x126   :  { %v2496_v44 = vpop.eup %2495 }
 0x127   :  { %v2498_v45 = vpop.eup %2497 }
 0x128   :  { %v2500_v46 = vpop.eup %2499  ;;  %2127 = vmatpush3.bf16.msra.mxu1 %v323_v41  ;;  %v325_v47 = vpack.c.bf16 %v2498_v45, %v2494_v43 }
 0x129   :  { %v324_v49 = vpack.c.bf16 %v2500_v46, %v2496_v44 }
 0x12b   :  { %2128 = vmatprep.subr.bf16.mxu1 %v324_v49 }
 0x12c   :  { %2129 = vmatpush3.bf16.msra.mxu1 %v324_v49 }
 0x12d   :  { %2130 = vmatprep.subr.bf16.mxu1 %v325_v47 }
 0x130   :  { %2131 = vmatpush3.bf16.msra.mxu1 %v325_v47 }
 0x131   :  { %2140 = vmatprep.subr.msk.bf16.mxu1 %vm1791_vm12, %v2700_v13 }
 0x133   :  { %2133 = vmatmul.mubr.msk.bf16.vlgmr.msra.gmra.mrb[0].mxu1 %vm102_vm0, %v2782_v11 }
 0x134   :  { %2141 = vmatpush3.bf16.msk.msra.mxu1 %vm1791_vm12, %v2700_v13  ;;  %2136 = vmatprep.mubr.msk.bf16.mxu1 %vm102_vm0, %v2789_v12  ;;  %vm1801_vm12 = vmpackc.low %vm408_vm11, %vm407_vm10  ;;  %vm589_vm10 = vcmp.eq.s32.totalorder %v2765_v7, %v1811_v30  ;;  %vm590_vm11 = vcmp.eq.s32.totalorder %v2773_v9, %v1811_v30 }
 0x135   :  { %2142 = vmatprep.subr.msk.bf16.mxu1 %vm1793_vm15, %v2700_v13 }
 0x138   :  { %2143 = vmatpush3.bf16.msk.msra.mxu1 %vm1793_vm15, %v2700_v13  ;;  %vm1803_vm15 = vmpackc.low %vm410_vm14, %vm409_vm13  ;;  %vm591_vm13 = vcmp.eq.s32.totalorder %v2799_v14, %v1811_v30  ;;  %vm592_vm14 = vcmp.eq.s32.totalorder %v2802_v15, %v1811_v30 }
 0x139   :  { %2144 = vmatprep.subr.msk.bf16.mxu1 %vm1795_vm3, %v2700_v13 }
 0x13b   :  { %2137 = vmatmul.mubr.msk.bf16.gmra.mrb[4].mxu1 %vm102_vm0, %v2819_v18 }
 0x13c   :  { %2145 = vmatpush3.bf16.msk.msra.mxu1 %vm1795_vm3, %v2700_v13  ;;  %2156 = vmatprep.mubr.bf16.mxu1 %v2825_v19  ;;  %vm1805_vm3 = vmpackc.low %vm412_vm2, %vm411_vm1  ;;  %vm593_vm1 = vcmp.eq.s32.totalorder %v2809_v16, %v1811_v30  ;;  %vm594_vm2 = vcmp.eq.s32.totalorder %v2814_v17, %v1811_v30 }
 0x13d   :  { %2146 = vmatprep.subr.msk.bf16.mxu1 %vm1797_vm6, %v2700_v13 }
 0x140   :  { %2147 = vmatpush3.bf16.msk.msra.mxu1 %vm1797_vm6, %v2700_v13  ;;  %vm1812_vm6 = vmpackc.low %vm586_vm5, %vm585_vm4  ;;  %vm595_vm4 = vcmp.eq.s32.totalorder %v2831_v20, %v1811_v30  ;;  %vm596_vm5 = vcmp.eq.s32.totalorder %v2834_v21, %v1811_v30 }
 0x141   :  { %2148 = vmatprep.subr.msk.bf16.mxu1 %vm1799_vm9, %v2700_v13 }
 0x144   :  { %2149 = vmatpush3.bf16.msk.msra.mxu1 %vm1799_vm9, %v2700_v13  ;;  %vm1814_vm9 = vmpackc.low %vm588_vm8, %vm587_vm7  ;;  %vm597_vm7 = vcmp.eq.s32.totalorder %v2844_v22, %v1811_v30  ;;  %vm598_vm8 = vcmp.eq.s32.totalorder %v2847_v23, %v1811_v30 }
 0x145   :  { %2150 = vmatprep.subr.msk.bf16.mxu1 %vm1801_vm12, %v2700_v13 }
 0x148   :  { %2151 = vmatpush3.bf16.msk.msra.mxu1 %vm1801_vm12, %v2700_v13  ;;  %vm1816_vm12 = vmpackc.low %vm590_vm11, %vm589_vm10  ;;  %vm599_vm10 = vcmp.eq.s32.totalorder %v2854_v24, %v1811_v30  ;;  %vm600_vm11 = vcmp.eq.s32.totalorder %v2857_v25, %v1811_v30 }
 0x149   :  { %2152 = vmatprep.subr.msk.bf16.mxu1 %vm1803_vm15, %v2700_v13 }
 0x14c   :  { %2153 = vmatpush3.bf16.msk.msra.mxu1 %vm1803_vm15, %v2700_v13  ;;  %vm1818_vm15 = vmpackc.low %vm592_vm14, %vm591_vm13 }
 0x14d   :  { %2154 = vmatprep.subr.msk.bf16.mxu1 %vm1805_vm3, %v2700_v13 }
 0x150   :  { %2155 = vmatpush3.bf16.msk.msra.mxu1 %vm1805_vm3, %v2700_v13  ;;  %vm1820_vm3 = vmpackc.low %vm594_vm2, %vm593_vm1 }
 0x153   :  { %2157 = vmatmul.mubr.bf16.vlgmr.msra.gmra.mrb[0].mxu1 %v2870_v26 }
 0x154   :  { %2160 = vmatprep.mubr.bf16.mxu1 %v2876_v27 }
 0x15b   :  { %2161 = vmatmul.mubr.bf16.gmra.mrb[4].mxu1 %v2883_v28 }
 0x15c   :  { %2212 = vmatprep.mubr.msk.bf16.mxu1 %vm102_vm0, %v2770_v8 }
 0x226   :  { %v2158_v50 = vpop.f32.mrb[0].mxu1 }
 0x227   :  { %2501 = vtanh.f32 %v2158_v50  ;;  %v471_v51 = vpop.f32.mrb[1].mxu1 }
 0x228   :  { %2503 = vtanh.f32 %v471_v51  ;;  %v2159_v52 = vpop.f32.mrb[2].mxu1  ;;  %v1832_v51 = vld [vmem:[#allocation3 + $0x3] ss:$0 sm:$0xff] }
 0x229   :  { %2505 = vtanh.f32 %v2159_v52  ;;  %v474_v53 = vpop.f32.mrb[3].mxu1  ;;  %vm773_vm13 = vcmp.eq.s32.totalorder %v2753_v3, %v1832_v51  ;;  %vm774_vm14 = vcmp.eq.s32.totalorder %v2756_v4, %v1832_v51  ;;  %vm775_vm1 = vcmp.eq.s32.totalorder %v2759_v5, %v1832_v51 }
 0x22a   :  { %2507 = vtanh.f32 %v474_v53  ;;  %vm776_vm2 = vcmp.eq.s32.totalorder %v2762_v6, %v1832_v51 }
 0x22e   :  { %v2162_v54 = vpop.f32.mrb[4].mxu1 }
 0x22f   :  { %2509 = vtanh.f32 %v2162_v54  ;;  %v487_v55 = vpop.f32.mrb[5].mxu1 }
 0x230   :  { %2511 = vtanh.f32 %v487_v55  ;;  %v2163_v56 = vpop.f32.mrb[6].mxu1 }
 0x231   :  { %v2502_v57 = vpop.eup %2501  ;;  %2513 = vtanh.f32 %v2163_v56  ;;  %v490_v58 = vpop.f32.mrb[7].mxu1 }
 0x232   :  { %v2504_v59 = vpop.eup %2503  ;;  %2515 = vtanh.f32 %v490_v58 }
 0x233   :  { %v2506_v60 = vpop.eup %2505 }
 0x234   :  { %v2508_v61 = vpop.eup %2507  ;;  %v511_v62 = vpack.c.bf16 %v2506_v60, %v2502_v57 }
 0x235   :  { %v510_v63 = vpack.c.bf16 %v2508_v61, %v2504_v59 }
 0x237   :  { %2164 = vmatprep.subr.bf16.mxu0 %v510_v63 }
 0x238   :  { %2165 = vmatpush3.bf16.msra.mxu0 %v510_v63 }
 0x239   :  { %v2510_v0 = vpop.eup %2509  ;;  %2166 = vmatprep.subr.bf16.mxu0 %v511_v62 }
 0x23a   :  { %v2512_v1 = vpop.eup %2511 }
 0x23b   :  { %v2514_v2 = vpop.eup %2513 }
 0x23c   :  { %v2516_v10 = vpop.eup %2515  ;;  %2167 = vmatpush3.bf16.msra.mxu0 %v511_v62  ;;  %v513_v29 = vpack.c.bf16 %v2514_v2, %v2510_v0 }
 0x23d   :  { %v512_v31 = vpack.c.bf16 %v2516_v10, %v2512_v1 }
 0x23f   :  { %2168 = vmatprep.subr.bf16.mxu0 %v512_v31 }
 0x240   :  { %2169 = vmatpush3.bf16.msra.mxu0 %v512_v31 }
 0x241   :  { %2170 = vmatprep.subr.bf16.mxu0 %v513_v29 }
 0x244   :  { %2171 = vmatpush3.bf16.msra.mxu0 %v513_v29 }
 0x245   :  { %2180 = vmatprep.subr.msk.bf16.mxu0 %vm1812_vm6, %v2700_v13 }
 0x247   :  { %2173 = vmatmul.mubr.msk.bf16.vlgmr.msra.gmra.mrb[8].mxu0 %vm102_vm0, %v2782_v11 }
 0x248   :  { %2181 = vmatpush3.bf16.msk.msra.mxu0 %vm1812_vm6, %v2700_v13  ;;  %2176 = vmatprep.mubr.msk.bf16.mxu0 %vm102_vm0, %v2789_v12  ;;  %vm1822_vm6 = vmpackc.low %vm596_vm5, %vm595_vm4  ;;  %vm777_vm4 = vcmp.eq.s32.totalorder %v2765_v7, %v1832_v51  ;;  %vm778_vm5 = vcmp.eq.s32.totalorder %v2773_v9, %v1832_v51 }
 0x249   :  { %2182 = vmatprep.subr.msk.bf16.mxu0 %vm1814_vm9, %v2700_v13 }
 0x24c   :  { %2183 = vmatpush3.bf16.msk.msra.mxu0 %vm1814_vm9, %v2700_v13  ;;  %vm1824_vm9 = vmpackc.low %vm598_vm8, %vm597_vm7  ;;  %vm779_vm7 = vcmp.eq.s32.totalorder %v2799_v14, %v1832_v51  ;;  %vm780_vm8 = vcmp.eq.s32.totalorder %v2802_v15, %v1832_v51 }
 0x24d   :  { %2184 = vmatprep.subr.msk.bf16.mxu0 %vm1816_vm12, %v2700_v13 }
 0x24f   :  { %2177 = vmatmul.mubr.msk.bf16.gmra.mrb[12].mxu0 %vm102_vm0, %v2819_v18 }
 0x250   :  { %2185 = vmatpush3.bf16.msk.msra.mxu0 %vm1816_vm12, %v2700_v13  ;;  %2196 = vmatprep.mubr.bf16.mxu0 %v2825_v19  ;;  %vm1826_vm12 = vmpackc.low %vm600_vm11, %vm599_vm10  ;;  %vm781_vm10 = vcmp.eq.s32.totalorder %v2809_v16, %v1832_v51  ;;  %vm782_vm11 = vcmp.eq.s32.totalorder %v2814_v17, %v1832_v51 }
 0x251   :  { %2186 = vmatprep.subr.msk.bf16.mxu0 %vm1818_vm15, %v2700_v13 }
 0x254   :  { %2187 = vmatpush3.bf16.msk.msra.mxu0 %vm1818_vm15, %v2700_v13  ;;  %vm1833_vm15 = vmpackc.low %vm774_vm14, %vm773_vm13  ;;  %vm783_vm13 = vcmp.eq.s32.totalorder %v2831_v20, %v1832_v51  ;;  %vm784_vm14 = vcmp.eq.s32.totalorder %v2834_v21, %v1832_v51 }
 0x255   :  { %2188 = vmatprep.subr.msk.bf16.mxu0 %vm1820_vm3, %v2700_v13 }
 0x258   :  { %2189 = vmatpush3.bf16.msk.msra.mxu0 %vm1820_vm3, %v2700_v13  ;;  %vm1835_vm3 = vmpackc.low %vm776_vm2, %vm775_vm1  ;;  %vm785_vm1 = vcmp.eq.s32.totalorder %v2844_v22, %v1832_v51  ;;  %vm786_vm2 = vcmp.eq.s32.totalorder %v2847_v23, %v1832_v51 }
 0x259   :  { %2190 = vmatprep.subr.msk.bf16.mxu0 %vm1822_vm6, %v2700_v13 }
 0x25c   :  { %2191 = vmatpush3.bf16.msk.msra.mxu0 %vm1822_vm6, %v2700_v13  ;;  %vm1837_vm6 = vmpackc.low %vm778_vm5, %vm777_vm4  ;;  %vm787_vm4 = vcmp.eq.s32.totalorder %v2854_v24, %v1832_v51  ;;  %vm788_vm5 = vcmp.eq.s32.totalorder %v2857_v25, %v1832_v51 }
 0x25d   :  { %2192 = vmatprep.subr.msk.bf16.mxu0 %vm1824_vm9, %v2700_v13 }
 0x260   :  { %2193 = vmatpush3.bf16.msk.msra.mxu0 %vm1824_vm9, %v2700_v13  ;;  %vm1839_vm9 = vmpackc.low %vm780_vm8, %vm779_vm7 }
 0x261   :  { %2194 = vmatprep.subr.msk.bf16.mxu0 %vm1826_vm12, %v2700_v13 }
 0x264   :  { %2195 = vmatpush3.bf16.msk.msra.mxu0 %vm1826_vm12, %v2700_v13  ;;  %vm1841_vm12 = vmpackc.low %vm782_vm11, %vm781_vm10 }
 0x267   :  { %2197 = vmatmul.mubr.bf16.vlgmr.msra.gmra.mrb[8].mxu0 %v2870_v26 }
 0x268   :  { %2200 = vmatprep.mubr.bf16.mxu0 %v2876_v27 }
 0x26f   :  { %2201 = vmatmul.mubr.bf16.gmra.mrb[12].mxu0 %v2883_v28 }
 0x270   :  { %2252 = vmatprep.mubr.msk.bf16.mxu0 %vm102_vm0, %v2770_v8 }
 0x33a   :  { %v2198_v32 = vpop.f32.mrb[8].mxu0 }
 0x33b   :  { %2517 = vtanh.f32 %v2198_v32  ;;  %v659_v33 = vpop.f32.mrb[9].mxu0 }
 0x33c   :  { %2519 = vtanh.f32 %v659_v33  ;;  %v2199_v34 = vpop.f32.mrb[10].mxu0  ;;  %v1853_v33 = vld [vmem:[#allocation3 + $0x4] ss:$0 sm:$0xff] }
 0x33d   :  { %2521 = vtanh.f32 %v2199_v34  ;;  %v662_v35 = vpop.f32.mrb[11].mxu0  ;;  %vm961_vm7 = vcmp.eq.s32.totalorder %v2753_v3, %v1853_v33  ;;  %vm962_vm8 = vcmp.eq.s32.totalorder %v2756_v4, %v1853_v33  ;;  %vm963_vm10 = vcmp.eq.s32.totalorder %v2759_v5, %v1853_v33 }
 0x33e   :  { %2523 = vtanh.f32 %v662_v35  ;;  %vm964_vm11 = vcmp.eq.s32.totalorder %v2762_v6, %v1853_v33 }
 0x342   :  { %v2202_v36 = vpop.f32.mrb[12].mxu0 }
 0x343   :  { %2525 = vtanh.f32 %v2202_v36  ;;  %v675_v37 = vpop.f32.mrb[13].mxu0 }
 0x344   :  { %2527 = vtanh.f32 %v675_v37  ;;  %v2203_v38 = vpop.f32.mrb[14].mxu0 }
 0x345   :  { %v2518_v39 = vpop.eup %2517  ;;  %2529 = vtanh.f32 %v2203_v38  ;;  %v678_v40 = vpop.f32.mrb[15].mxu0 }
 0x346   :  { %v2520_v41 = vpop.eup %2519  ;;  %2531 = vtanh.f32 %v678_v40 }
 0x347   :  { %v2522_v42 = vpop.eup %2521 }
 0x348   :  { %v2524_v43 = vpop.eup %2523  ;;  %v699_v44 = vpack.c.bf16 %v2522_v42, %v2518_v39 }
 0x349   :  { %v698_v45 = vpack.c.bf16 %v2524_v43, %v2520_v41 }
 0x34b   :  { %2204 = vmatprep.subr.bf16.mxu1 %v698_v45 }
 0x34c   :  { %2205 = vmatpush3.bf16.msra.mxu1 %v698_v45 }
 0x34d   :  { %v2526_v46 = vpop.eup %2525  ;;  %2206 = vmatprep.subr.bf16.mxu1 %v699_v44 }
 0x34e   :  { %v2528_v47 = vpop.eup %2527 }
 0x34f   :  { %v2530_v48 = vpop.eup %2529 }
 0x350   :  { %v2532_v49 = vpop.eup %2531  ;;  %2207 = vmatpush3.bf16.msra.mxu1 %v699_v44  ;;  %v701_v50 = vpack.c.bf16 %v2530_v48, %v2526_v46 }
 0x351   :  { %v700_v52 = vpack.c.bf16 %v2532_v49, %v2528_v47 }
 0x353   :  { %2208 = vmatprep.subr.bf16.mxu1 %v700_v52 }
 0x354   :  { %2209 = vmatpush3.bf16.msra.mxu1 %v700_v52 }
 0x355   :  { %2210 = vmatprep.subr.bf16.mxu1 %v701_v50 }
 0x358   :  { %2211 = vmatpush3.bf16.msra.mxu1 %v701_v50 }
 0x359   :  { %2220 = vmatprep.subr.msk.bf16.mxu1 %vm1833_vm15, %v2700_v13 }
 0x35b   :  { %2213 = vmatmul.mubr.msk.bf16.vlgmr.msra.gmra.mrb[8].mxu1 %vm102_vm0, %v2782_v11 }
 0x35c   :  { %2221 = vmatpush3.bf16.msk.msra.mxu1 %vm1833_vm15, %v2700_v13  ;;  %2216 = vmatprep.mubr.msk.bf16.mxu1 %vm102_vm0, %v2789_v12  ;;  %vm1843_vm15 = vmpackc.low %vm784_vm14, %vm783_vm13  ;;  %vm965_vm13 = vcmp.eq.s32.totalorder %v2765_v7, %v1853_v33  ;;  %vm966_vm14 = vcmp.eq.s32.totalorder %v2773_v9, %v1853_v33 }
 0x35d   :  { %2222 = vmatprep.subr.msk.bf16.mxu1 %vm1835_vm3, %v2700_v13 }
 0x360   :  { %2223 = vmatpush3.bf16.msk.msra.mxu1 %vm1835_vm3, %v2700_v13  ;;  %vm1845_vm3 = vmpackc.low %vm786_vm2, %vm785_vm1  ;;  %vm967_vm1 = vcmp.eq.s32.totalorder %v2799_v14, %v1853_v33  ;;  %vm968_vm2 = vcmp.eq.s32.totalorder %v2802_v15, %v1853_v33 }
 0x361   :  { %2224 = vmatprep.subr.msk.bf16.mxu1 %vm1837_vm6, %v2700_v13 }
 0x363   :  { %2217 = vmatmul.mubr.msk.bf16.gmra.mrb[12].mxu1 %vm102_vm0, %v2819_v18 }
 0x364   :  { %2225 = vmatpush3.bf16.msk.msra.mxu1 %vm1837_vm6, %v2700_v13  ;;  %2236 = vmatprep.mubr.bf16.mxu1 %v2825_v19  ;;  %vm1847_vm6 = vmpackc.low %vm788_vm5, %vm787_vm4  ;;  %vm969_vm4 = vcmp.eq.s32.totalorder %v2809_v16, %v1853_v33  ;;  %vm970_vm5 = vcmp.eq.s32.totalorder %v2814_v17, %v1853_v33 }
 0x365   :  { %2226 = vmatprep.subr.msk.bf16.mxu1 %vm1839_vm9, %v2700_v13 }
 0x368   :  { %2227 = vmatpush3.bf16.msk.msra.mxu1 %vm1839_vm9, %v2700_v13  ;;  %vm1854_vm9 = vmpackc.low %vm962_vm8, %vm961_vm7  ;;  %vm971_vm7 = vcmp.eq.s32.totalorder %v2831_v20, %v1853_v33  ;;  %vm972_vm8 = vcmp.eq.s32.totalorder %v2834_v21, %v1853_v33 }
 0x369   :  { %2228 = vmatprep.subr.msk.bf16.mxu1 %vm1841_vm12, %v2700_v13 }
 0x36c   :  { %2229 = vmatpush3.bf16.msk.msra.mxu1 %vm1841_vm12, %v2700_v13  ;;  %vm1856_vm12 = vmpackc.low %vm964_vm11, %vm963_vm10  ;;  %vm973_vm10 = vcmp.eq.s32.totalorder %v2844_v22, %v1853_v33  ;;  %vm974_vm11 = vcmp.eq.s32.totalorder %v2847_v23, %v1853_v33 }
 0x36d   :  { %2230 = vmatprep.subr.msk.bf16.mxu1 %vm1843_vm15, %v2700_v13 }
 0x370   :  { %2231 = vmatpush3.bf16.msk.msra.mxu1 %vm1843_vm15, %v2700_v13  ;;  %vm1858_vm15 = vmpackc.low %vm966_vm14, %vm965_vm13  ;;  %vm975_vm13 = vcmp.eq.s32.totalorder %v2854_v24, %v1853_v33  ;;  %vm976_vm14 = vcmp.eq.s32.totalorder %v2857_v25, %v1853_v33  ;;  %v3140_v33 = vld [vmem:[%s3285_s2 + $0x18] sm:$0xff]  }
 0x371   :  { %2232 = vmatprep.subr.msk.bf16.mxu1 %vm1845_vm3, %v2700_v13 }
 0x374   :  { %2233 = vmatpush3.bf16.msk.msra.mxu1 %vm1845_vm3, %v2700_v13  ;;  %vm1860_vm3 = vmpackc.low %vm968_vm2, %vm967_vm1 }
 0x375   :  { %2234 = vmatprep.subr.msk.bf16.mxu1 %vm1847_vm6, %v2700_v13 }
 0x378   :  { %2235 = vmatpush3.bf16.msk.msra.mxu1 %vm1847_vm6, %v2700_v13  ;;  %vm1862_vm6 = vmpackc.low %vm970_vm5, %vm969_vm4 }
 0x37b   :  { %2237 = vmatmul.mubr.bf16.vlgmr.msra.gmra.mrb[8].mxu1 %v2870_v26 }
 0x37c   :  { %2240 = vmatprep.mubr.bf16.mxu1 %v2876_v27 }
 0x383   :  { %2241 = vmatmul.mubr.bf16.gmra.mrb[12].mxu1 %v2883_v28 }
 0x384   :  { %2292 = vmatprep.mubr.msk.bf16.mxu1 %vm102_vm0, %v2770_v8 }
 0x44e   :  { %v2238_v53 = vpop.f32.mrb[8].mxu1 }
 0x44f   :  { %2533 = vtanh.f32 %v2238_v53  ;;  %v847_v54 = vpop.f32.mrb[9].mxu1 }
 0x450   :  { %2535 = vtanh.f32 %v847_v54  ;;  %v2239_v55 = vpop.f32.mrb[10].mxu1  ;;  %v1874_v54 = vld [vmem:[#allocation3 + $0x5] ss:$0 sm:$0xff] }
 0x451   :  { %2537 = vtanh.f32 %v2239_v55  ;;  %v850_v56 = vpop.f32.mrb[11].mxu1  ;;  %vm1149_vm1 = vcmp.eq.s32.totalorder %v2753_v3, %v1874_v54  ;;  %vm1150_vm2 = vcmp.eq.s32.totalorder %v2756_v4, %v1874_v54  ;;  %vm1151_vm4 = vcmp.eq.s32.totalorder %v2759_v5, %v1874_v54 }
 0x452   :  { %2539 = vtanh.f32 %v850_v56  ;;  %vm1152_vm5 = vcmp.eq.s32.totalorder %v2762_v6, %v1874_v54 }
 0x456   :  { %v2242_v57 = vpop.f32.mrb[12].mxu1 }
 0x457   :  { %2541 = vtanh.f32 %v2242_v57  ;;  %v863_v58 = vpop.f32.mrb[13].mxu1 }
 0x458   :  { %2543 = vtanh.f32 %v863_v58  ;;  %v2243_v59 = vpop.f32.mrb[14].mxu1 }
 0x459   :  { %v2534_v60 = vpop.eup %2533  ;;  %2545 = vtanh.f32 %v2243_v59  ;;  %v866_v61 = vpop.f32.mrb[15].mxu1 }
 0x45a   :  { %v2536_v62 = vpop.eup %2535  ;;  %2547 = vtanh.f32 %v866_v61 }
 0x45b   :  { %v2538_v63 = vpop.eup %2537 }
 0x45c   :  { %v2540_v0 = vpop.eup %2539  ;;  %v887_v1 = vpack.c.bf16 %v2538_v63, %v2534_v60 }
 0x45d   :  { %v886_v2 = vpack.c.bf16 %v2540_v0, %v2536_v62 }
 0x45f   :  { %2244 = vmatprep.subr.bf16.mxu0 %v886_v2 }
 0x460   :  { %2245 = vmatpush3.bf16.msra.mxu0 %v886_v2 }
 0x461   :  { %v2542_v10 = vpop.eup %2541  ;;  %2246 = vmatprep.subr.bf16.mxu0 %v887_v1 }
 0x462   :  { %v2544_v29 = vpop.eup %2543 }
 0x463   :  { %v2546_v30 = vpop.eup %2545 }
 0x464   :  { %v2548_v31 = vpop.eup %2547  ;;  %2247 = vmatpush3.bf16.msra.mxu0 %v887_v1  ;;  %v889_v32 = vpack.c.bf16 %v2546_v30, %v2542_v10 }
 0x465   :  { %v888_v34 = vpack.c.bf16 %v2548_v31, %v2544_v29  ;;  %v1895_v29 = vld [vmem:[#allocation3 + $0x6] ss:$0 sm:$0xff]  ;;  %v3116_v31 = vld [vmem:[%s3285_s2 + $0x8] sm:$0xff]  }
 0x467   :  { %2248 = vmatprep.subr.bf16.mxu0 %v888_v34 }
 0x468   :  { %2249 = vmatpush3.bf16.msra.mxu0 %v888_v34  ;;  %v3148_v34 = vld [vmem:[%s3284_s1] sm:$0xff]  }
 0x469   :  { %2250 = vmatprep.subr.bf16.mxu0 %v889_v32 }
 0x46c   :  { %2251 = vmatpush3.bf16.msra.mxu0 %v889_v32  ;;  %v3126_v32 = vld [vmem:[%s3285_s2 + $0x10] sm:$0xff]  }
 0x46d   :  { %2260 = vmatprep.subr.msk.bf16.mxu0 %vm1854_vm9, %v2700_v13 }
 0x46f   :  { %2253 = vmatmul.mubr.msk.bf16.vlgmr.msra.gmra.mrb[16].mxu0 %vm102_vm0, %v2782_v11 }
 0x470   :  { %2261 = vmatpush3.bf16.msk.msra.mxu0 %vm1854_vm9, %v2700_v13  ;;  %2256 = vmatprep.mubr.msk.bf16.mxu0 %vm102_vm0, %v2789_v12  ;;  %vm1864_vm9 = vmpackc.low %vm972_vm8, %vm971_vm7  ;;  %vm1153_vm7 = vcmp.eq.s32.totalorder %v2765_v7, %v1874_v54  ;;  %vm1154_vm8 = vcmp.eq.s32.totalorder %v2773_v9, %v1874_v54 }
 0x471   :  { %2262 = vmatprep.subr.msk.bf16.mxu0 %vm1856_vm12, %v2700_v13 }
 0x474   :  { %2263 = vmatpush3.bf16.msk.msra.mxu0 %vm1856_vm12, %v2700_v13  ;;  %vm1866_vm12 = vmpackc.low %vm974_vm11, %vm973_vm10  ;;  %vm1155_vm10 = vcmp.eq.s32.totalorder %v2799_v14, %v1874_v54  ;;  %vm1156_vm11 = vcmp.eq.s32.totalorder %v2802_v15, %v1874_v54 }
 0x475   :  { %2264 = vmatprep.subr.msk.bf16.mxu0 %vm1858_vm15, %v2700_v13 }
 0x477   :  { %2257 = vmatmul.mubr.msk.bf16.gmra.mrb[20].mxu0 %vm102_vm0, %v2819_v18 }
 0x478   :  { %2265 = vmatpush3.bf16.msk.msra.mxu0 %vm1858_vm15, %v2700_v13  ;;  %2276 = vmatprep.mubr.bf16.mxu0 %v2825_v19  ;;  %vm1868_vm15 = vmpackc.low %vm976_vm14, %vm975_vm13  ;;  %vm1157_vm13 = vcmp.eq.s32.totalorder %v2809_v16, %v1874_v54  ;;  %vm1158_vm14 = vcmp.eq.s32.totalorder %v2814_v17, %v1874_v54 }
 0x479   :  { %2266 = vmatprep.subr.msk.bf16.mxu0 %vm1860_vm3, %v2700_v13 }
 0x47c   :  { %2267 = vmatpush3.bf16.msk.msra.mxu0 %vm1860_vm3, %v2700_v13  ;;  %vm1875_vm3 = vmpackc.low %vm1150_vm2, %vm1149_vm1  ;;  %vm1159_vm1 = vcmp.eq.s32.totalorder %v2831_v20, %v1874_v54  ;;  %vm1160_vm2 = vcmp.eq.s32.totalorder %v2834_v21, %v1874_v54 }
 0x47d   :  { %2268 = vmatprep.subr.msk.bf16.mxu0 %vm1862_vm6, %v2700_v13 }
 0x480   :  { %2269 = vmatpush3.bf16.msk.msra.mxu0 %vm1862_vm6, %v2700_v13  ;;  %vm1877_vm6 = vmpackc.low %vm1152_vm5, %vm1151_vm4  ;;  %vm1161_vm4 = vcmp.eq.s32.totalorder %v2844_v22, %v1874_v54  ;;  %vm1162_vm5 = vcmp.eq.s32.totalorder %v2847_v23, %v1874_v54 }
 0x481   :  { %2270 = vmatprep.subr.msk.bf16.mxu0 %vm1864_vm9, %v2700_v13 }
 0x484   :  { %2271 = vmatpush3.bf16.msk.msra.mxu0 %vm1864_vm9, %v2700_v13  ;;  %vm1879_vm9 = vmpackc.low %vm1154_vm8, %vm1153_vm7  ;;  %vm1163_vm7 = vcmp.eq.s32.totalorder %v2854_v24, %v1874_v54  ;;  %vm1164_vm8 = vcmp.eq.s32.totalorder %v2857_v25, %v1874_v54 }
 0x485   :  { %2272 = vmatprep.subr.msk.bf16.mxu0 %vm1866_vm12, %v2700_v13 }
 0x488   :  { %2273 = vmatpush3.bf16.msk.msra.mxu0 %vm1866_vm12, %v2700_v13  ;;  %vm1881_vm12 = vmpackc.low %vm1156_vm11, %vm1155_vm10  ;;  %vm1337_vm10 = vcmp.eq.s32.totalorder %v2753_v3, %v1895_v29  ;;  %vm1338_vm11 = vcmp.eq.s32.totalorder %v2756_v4, %v1895_v29 }
 0x489   :  { %2274 = vmatprep.subr.msk.bf16.mxu0 %vm1868_vm15, %v2700_v13 }
 0x48c   :  { %2275 = vmatpush3.bf16.msk.msra.mxu0 %vm1868_vm15, %v2700_v13  ;;  %vm1883_vm15 = vmpackc.low %vm1158_vm14, %vm1157_vm13  ;;  %vm1339_vm13 = vcmp.eq.s32.totalorder %v2759_v5, %v1895_v29  ;;  %vm1340_vm14 = vcmp.eq.s32.totalorder %v2762_v6, %v1895_v29 }
 0x48f   :  { %2277 = vmatmul.mubr.bf16.vlgmr.msra.gmra.mrb[16].mxu0 %v2870_v26 }
 0x490   :  { %2280 = vmatprep.mubr.bf16.mxu0 %v2876_v27 }
 0x497   :  { %2281 = vmatmul.mubr.bf16.gmra.mrb[20].mxu0 %v2883_v28 }
 0x498   :  { %2332 = vmatprep.mubr.msk.bf16.mxu0 %vm102_vm0, %v2770_v8 }
 0x562   :  { %v2278_v35 = vpop.f32.mrb[16].mxu0 }
 0x563   :  { %2549 = vtanh.f32 %v2278_v35  ;;  %v1035_v36 = vpop.f32.mrb[17].mxu0  ;;  %v3170_v35 = vld [vmem:[%s3284_s1 + $0x8] sm:$0xff]  }
 0x564   :  { %2551 = vtanh.f32 %v1035_v36  ;;  %v2279_v37 = vpop.f32.mrb[18].mxu0  ;;  %v3176_v36 = vld [vmem:[%s3284_s1 + $0x10] sm:$0xff]  }
 0x565   :  { %2553 = vtanh.f32 %v2279_v37  ;;  %v1038_v38 = vpop.f32.mrb[19].mxu0  ;;  %v57_v37 = vld [vmem:[%s3286_s3] sm:$0xff] }
 0x566   :  { %2555 = vtanh.f32 %v1038_v38  ;;  %v59_v38 = vld [vmem:[%s3286_s3 + $0x10] sm:$0xff]  ;;  %1640 = vperm.xlu0 %2475, %v57_v37  }
 0x567   :  { %1650 = vperm.xlu1 %2476, %v59_v38  }
 0x56a   :  { %v2282_v39 = vpop.f32.mrb[20].mxu0 }
 0x56b   :  { %2557 = vtanh.f32 %v2282_v39  ;;  %v1051_v40 = vpop.f32.mrb[21].mxu0  ;;  %v58_v39 = vld [vmem:[%s3286_s3 + $0x8] sm:$0xff] }
 0x56c   :  { %2559 = vtanh.f32 %v1051_v40  ;;  %v2283_v41 = vpop.f32.mrb[22].mxu0  ;;  %v60_v40 = vld [vmem:[%s3286_s3 + $0x18] sm:$0xff]  ;;  %1645 = vperm.xlu0 %2475, %v58_v39  }
 0x56d   :  { %v2550_v42 = vpop.eup %2549  ;;  %2561 = vtanh.f32 %v2283_v41  ;;  %v1054_v43 = vpop.f32.mrb[23].mxu0  ;;  %1655 = vperm.xlu1 %2476, %v60_v40   ;;  %v62_v41 = vld [vmem:[%s3286_s3 + $0x28] sm:$0xff] }
 0x56e   :  { %v2552_v44 = vpop.eup %2551  ;;  %2563 = vtanh.f32 %v1054_v43  ;;  %v64_v43 = vld [vmem:[%s3286_s3 + $0x38] sm:$0xff] }
 0x56f   :  { %v2554_v45 = vpop.eup %2553 }
 0x570   :  { %v2556_v46 = vpop.eup %2555  ;;  %v1075_v47 = vpack.c.bf16 %v2554_v45, %v2550_v42  ;;  %v63_v42 = vld [vmem:[%s3286_s3 + $0x30] sm:$0xff] }
 0x571   :  { %v1074_v48 = vpack.c.bf16 %v2556_v46, %v2552_v44  ;;  %1665 = vperm.xlu1 %2476, %v62_v41   ;;  %v1708_v44 = vld [vmem:[#allocation2] sm:$0x1] }
 0x573   :  { %2284 = vmatprep.subr.bf16.mxu1 %v1074_v48 }
 0x574   :  { %2285 = vmatpush3.bf16.msra.mxu1 %v1074_v48 }
 0x575   :  { %v2558_v49 = vpop.eup %2557  ;;  %2286 = vmatprep.subr.bf16.mxu1 %v1075_v47  ;;  %1675 = vperm.xlu1 %2476, %v64_v43  }
 0x576   :  { %v2560_v50 = vpop.eup %2559 }
 0x577   :  { %v2562_v51 = vpop.eup %2561 }
 0x578   :  { %v2564_v52 = vpop.eup %2563  ;;  %2287 = vmatpush3.bf16.msra.mxu1 %v1075_v47  ;;  %v1077_v53 = vpack.c.bf16 %v2562_v51, %v2558_v49 }
 0x579   :  { %v1076_v55 = vpack.c.bf16 %v2564_v52, %v2560_v50 }
 0x57b   :  { %2288 = vmatprep.subr.bf16.mxu1 %v1076_v55 }
 0x57c   :  { %2289 = vmatpush3.bf16.msra.mxu1 %v1076_v55 }
 0x57d   :  { %2290 = vmatprep.subr.bf16.mxu1 %v1077_v53 }
 0x580   :  { %2291 = vmatpush3.bf16.msra.mxu1 %v1077_v53 }
 0x581   :  { %2300 = vmatprep.subr.msk.bf16.mxu1 %vm1875_vm3, %v2700_v13 }
 0x583   :  { %2293 = vmatmul.mubr.msk.bf16.vlgmr.msra.gmra.mrb[16].mxu1 %vm102_vm0, %v2782_v11 }
 0x584   :  { %2301 = vmatpush3.bf16.msk.msra.mxu1 %vm1875_vm3, %v2700_v13  ;;  %2296 = vmatprep.mubr.msk.bf16.mxu1 %vm102_vm0, %v2789_v12  ;;  %vm1885_vm3 = vmpackc.low %vm1160_vm2, %vm1159_vm1  ;;  %vm1341_vm1 = vcmp.eq.s32.totalorder %v2765_v7, %v1895_v29  ;;  %vm1342_vm2 = vcmp.eq.s32.totalorder %v2773_v9, %v1895_v29 }
 0x585   :  { %2302 = vmatprep.subr.msk.bf16.mxu1 %vm1877_vm6, %v2700_v13 }
 0x588   :  { %2303 = vmatpush3.bf16.msk.msra.mxu1 %vm1877_vm6, %v2700_v13  ;;  %vm1887_vm6 = vmpackc.low %vm1162_vm5, %vm1161_vm4  ;;  %vm1343_vm4 = vcmp.eq.s32.totalorder %v2799_v14, %v1895_v29  ;;  %vm1344_vm5 = vcmp.eq.s32.totalorder %v2802_v15, %v1895_v29 }
 0x589   :  { %2304 = vmatprep.subr.msk.bf16.mxu1 %vm1879_vm9, %v2700_v13 }
 0x58b   :  { %2297 = vmatmul.mubr.msk.bf16.gmra.mrb[20].mxu1 %vm102_vm0, %v2819_v18 }
 0x58c   :  { %2305 = vmatpush3.bf16.msk.msra.mxu1 %vm1879_vm9, %v2700_v13  ;;  %2316 = vmatprep.mubr.bf16.mxu1 %v2825_v19  ;;  %vm1889_vm9 = vmpackc.low %vm1164_vm8, %vm1163_vm7  ;;  %vm1345_vm7 = vcmp.eq.s32.totalorder %v2809_v16, %v1895_v29  ;;  %vm1346_vm8 = vcmp.eq.s32.totalorder %v2814_v17, %v1895_v29 }
 0x58d   :  { %2306 = vmatprep.subr.msk.bf16.mxu1 %vm1881_vm12, %v2700_v13 }
 0x590   :  { %2307 = vmatpush3.bf16.msk.msra.mxu1 %vm1881_vm12, %v2700_v13  ;;  %vm1896_vm12 = vmpackc.low %vm1338_vm11, %vm1337_vm10  ;;  %vm1347_vm10 = vcmp.eq.s32.totalorder %v2831_v20, %v1895_v29  ;;  %vm1348_vm11 = vcmp.eq.s32.totalorder %v2834_v21, %v1895_v29 }
 0x591   :  { %2308 = vmatprep.subr.msk.bf16.mxu1 %vm1883_vm15, %v2700_v13 }
 0x594   :  { %2309 = vmatpush3.bf16.msk.msra.mxu1 %vm1883_vm15, %v2700_v13  ;;  %vm1898_vm15 = vmpackc.low %vm1340_vm14, %vm1339_vm13  ;;  %vm1349_vm13 = vcmp.eq.s32.totalorder %v2844_v22, %v1895_v29  ;;  %vm1350_vm14 = vcmp.eq.s32.totalorder %v2847_v23, %v1895_v29 }
 0x595   :  { %2310 = vmatprep.subr.msk.bf16.mxu1 %vm1885_vm3, %v2700_v13 }
 0x598   :  { %2311 = vmatpush3.bf16.msk.msra.mxu1 %vm1885_vm3, %v2700_v13  ;;  %vm1900_vm3 = vmpackc.low %vm1342_vm2, %vm1341_vm1  ;;  %vm1351_vm1 = vcmp.eq.s32.totalorder %v2854_v24, %v1895_v29  ;;  %vm1352_vm2 = vcmp.eq.s32.totalorder %v2857_v25, %v1895_v29 }
 0x599   :  { %2312 = vmatprep.subr.msk.bf16.mxu1 %vm1887_vm6, %v2700_v13 }
 0x59c   :  { %2313 = vmatpush3.bf16.msk.msra.mxu1 %vm1887_vm6, %v2700_v13  ;;  %vm1902_vm6 = vmpackc.low %vm1344_vm5, %vm1343_vm4 }
 0x59d   :  { %2314 = vmatprep.subr.msk.bf16.mxu1 %vm1889_vm9, %v2700_v13 }
 0x5a0   :  { %2315 = vmatpush3.bf16.msk.msra.mxu1 %vm1889_vm9, %v2700_v13  ;;  %vm1904_vm9 = vmpackc.low %vm1346_vm8, %vm1345_vm7 }
 0x5a3   :  { %2317 = vmatmul.mubr.bf16.vlgmr.msra.gmra.mrb[16].mxu1 %v2870_v26 }
 0x5a4   :  { %2320 = vmatprep.mubr.bf16.mxu1 %v2876_v27 }
 0x5ab   :  { %2321 = vmatmul.mubr.bf16.gmra.mrb[20].mxu1 %v2883_v28 }
 0x5ac   :  { %2372 = vmatprep.mubr.msk.bf16.mxu1 %vm102_vm0, %v2770_v8 }
 0x676   :  { %v2318_v11 = vpop.f32.mrb[16].mxu1 }
 0x677   :  { %2565 = vtanh.f32 %v2318_v11  ;;  %v1223_v12 = vpop.f32.mrb[17].mxu1 }
 0x678   :  { %2567 = vtanh.f32 %v1223_v12  ;;  %v2319_v18 = vpop.f32.mrb[18].mxu1 }
 0x679   :  { %2569 = vtanh.f32 %v2319_v18  ;;  %v1226_v19 = vpop.f32.mrb[19].mxu1 }
 0x67a   :  { %2571 = vtanh.f32 %v1226_v19 }
 0x67e   :  { %v2322_v56 = vpop.f32.mrb[20].mxu1 }
 0x67f   :  { %2573 = vtanh.f32 %v2322_v56  ;;  %v1239_v57 = vpop.f32.mrb[21].mxu1 }
 0x680   :  { %2575 = vtanh.f32 %v1239_v57  ;;  %v2323_v26 = vpop.f32.mrb[22].mxu1 }
 0x681   :  { %v2566_v58 = vpop.eup %2565  ;;  %2577 = vtanh.f32 %v2323_v26  ;;  %v1242_v27 = vpop.f32.mrb[23].mxu1 }
 0x682   :  { %v2568_v59 = vpop.eup %2567  ;;  %2579 = vtanh.f32 %v1242_v27  ;;  %v1916_v27 = vld [vmem:[#allocation3 + $0x7] ss:$0 sm:$0xff] }
 0x683   :  { %v2570_v60 = vpop.eup %2569  ;;  %vm1525_vm4 = vcmp.eq.s32.totalorder %v2753_v3, %v1916_v27  ;;  %vm1526_vm5 = vcmp.eq.s32.totalorder %v2756_v4, %v1916_v27  ;;  %vm1527_vm7 = vcmp.eq.s32.totalorder %v2759_v5, %v1916_v27  ;;  %vm1528_vm8 = vcmp.eq.s32.totalorder %v2762_v6, %v1916_v27  ;;  %v2623_v4 = vld [vmem:[%s3284_s1 + $0x18] sm:$0xff]   ;;  %s2701_s1 = smov [#allocation7]  }
 0x684   :  { %v2572_v8 = vpop.eup %2571  ;;  %v1263_v61 = vpack.c.bf16 %v2570_v60, %v2566_v58  ;;  %s1744_s29 = sshll.u32 %s2701_s1, 4  ;;  %s1745_s29 = int_to_ptr.vmem [resolvable:$true] %s1744_s29 }
 0x685   :  { %v1262_v62 = vpack.c.bf16 %v2572_v8, %v2568_v59  ;;  %s2646_s30 = scalar_lea.vmem %s1745_s29, 16  ;;  %s2650_s7 = scalar_lea.vmem %s1745_s29, 32 }
 0x686   :  { %p2647_p8 = scmp.ne.s32.totalorder %s1745_s29, %s2646_s30  ;;  %p2651_p9 = scmp.lt.s32.totalorder %s1745_s29, %s1745_s29 }
 0x687   :  { %2324 = vmatprep.subr.bf16.mxu0 %v1262_v62  ;;  %p2652_p10 = scmp.lt.s32.totalorder %s2650_s7, %s2646_s30 }
 0x688   :  { %2325 = vmatpush3.bf16.msra.mxu0 %v1262_v62 }
 0x689   :  { %v2574_v63 = vpop.eup %2573  ;;  %2326 = vmatprep.subr.bf16.mxu0 %v1263_v61  ;;  %p2653_p11 = por %p2652_p10, %p2651_p9 }
 0x68a   :  { %v2576_v0 = vpop.eup %2575 }
 0x68b   :  { %v2578_v1 = vpop.eup %2577  ;;  %p2654_p12 = pnand %p2653_p11, %p2647_p8 }
 0x68c   :  { %v2580_v2 = vpop.eup %2579  ;;  %2327 = vmatpush3.bf16.msra.mxu0 %v1263_v61  ;;  %v1265_v10 = vpack.c.bf16 %v2578_v1, %v2574_v63 }
 0x68d   :  { %v1264_v30 = vpack.c.bf16 %v2580_v2, %v2576_v0 }
 0x68f   :  { %2328 = vmatprep.subr.bf16.mxu0 %v1264_v30 }
 0x690   :  { %2329 = vmatpush3.bf16.msra.mxu0 %v1264_v30 }
 0x691   :  { %2330 = vmatprep.subr.bf16.mxu0 %v1265_v10 }
 0x694   :  { %2331 = vmatpush3.bf16.msra.mxu0 %v1265_v10 }
 0x695   :  { %2340 = vmatprep.subr.msk.bf16.mxu0 %vm1896_vm12, %v2700_v13 }
 0x697   :  { %2333 = vmatmul.mubr.msk.bf16.vlgmr.msra.gmra.mrb[24].mxu0 %vm102_vm0, %v3116_v31 }
 0x698   :  { %2341 = vmatpush3.bf16.msk.msra.mxu0 %vm1896_vm12, %v2700_v13  ;;  %2336 = vmatprep.mubr.msk.bf16.mxu0 %vm102_vm0, %v3126_v32  ;;  %vm1906_vm12 = vmpackc.low %vm1348_vm11, %vm1347_vm10  ;;  %vm1529_vm10 = vcmp.eq.s32.totalorder %v2765_v7, %v1916_v27  ;;  %vm1530_vm11 = vcmp.eq.s32.totalorder %v2773_v9, %v1916_v27 }
 0x699   :  { %2342 = vmatprep.subr.msk.bf16.mxu0 %vm1898_vm15, %v2700_v13 }
 0x69c   :  { %2343 = vmatpush3.bf16.msk.msra.mxu0 %vm1898_vm15, %v2700_v13  ;;  %vm1908_vm15 = vmpackc.low %vm1350_vm14, %vm1349_vm13  ;;  %vm1531_vm13 = vcmp.eq.s32.totalorder %v2799_v14, %v1916_v27  ;;  %vm1532_vm14 = vcmp.eq.s32.totalorder %v2802_v15, %v1916_v27  ;;  %v1641_v14 = vpop.permute.xlu0 %1640  ;;  %v1651_v15 = vpop.permute.xlu1 %1650 }
 0x69d   :  { %2344 = vmatprep.subr.msk.bf16.mxu0 %vm1900_vm3, %v2700_v13 }
 0x69f   :  { %2337 = vmatmul.mubr.msk.bf16.gmra.mrb[28].mxu0 %vm102_vm0, %v3140_v33 }
 0x6a0   :  { %2345 = vmatpush3.bf16.msk.msra.mxu0 %vm1900_vm3, %v2700_v13  ;;  %2356 = vmatprep.mubr.bf16.mxu0 %v3148_v34  ;;  %vm1910_vm3 = vmpackc.low %vm1352_vm2, %vm1351_vm1  ;;  %vm1533_vm1 = vcmp.eq.s32.totalorder %v2809_v16, %v1916_v27  ;;  %vm1534_vm2 = vcmp.eq.s32.totalorder %v2814_v17, %v1916_v27  ;;  %v1646_v17 = vpop.permute.xlu0 %1645 }
 0x6a1   :  { %2346 = vmatprep.subr.msk.bf16.mxu0 %vm1902_vm6, %v2700_v13 }
 0x6a4   :  { %2347 = vmatpush3.bf16.msk.msra.mxu0 %vm1902_vm6, %v2700_v13  ;;  %vm1917_vm6 = vmpackc.low %vm1526_vm5, %vm1525_vm4  ;;  %vm1535_vm4 = vcmp.eq.s32.totalorder %v2831_v20, %v1916_v27  ;;  %vm1536_vm5 = vcmp.eq.s32.totalorder %v2834_v21, %v1916_v27 }
 0x6a5   :  { %2348 = vmatprep.subr.msk.bf16.mxu0 %vm1904_vm9, %v2700_v13 }
 0x6a8   :  { %2349 = vmatpush3.bf16.msk.msra.mxu0 %vm1904_vm9, %v2700_v13  ;;  %vm1919_vm9 = vmpackc.low %vm1528_vm8, %vm1527_vm7  ;;  %vm1537_vm7 = vcmp.eq.s32.totalorder %v2844_v22, %v1916_v27 }
 0x6a9   :  { %2350 = vmatprep.subr.msk.bf16.mxu0 %vm1906_vm12, %v2700_v13 }
 0x6ac   :  { %2351 = vmatpush3.bf16.msk.msra.mxu0 %vm1906_vm12, %v2700_v13  ;;  %vm1921_vm12 = vmpackc.low %vm1530_vm11, %vm1529_vm10  ;;  %vm1540_vm10 = vcmp.eq.s32.totalorder %v2857_v25, %v1916_v27 }
 0x6ad   :  { %2352 = vmatprep.subr.msk.bf16.mxu0 %vm1908_vm15, %v2700_v13 }
 0x6b0   :  { %2353 = vmatpush3.bf16.msk.msra.mxu0 %vm1908_vm15, %v2700_v13  ;;  %vm1923_vm15 = vmpackc.low %vm1532_vm14, %vm1531_vm13  ;;  %vm1725_vm13 = vcmask 57344  }
 0x6b1   :  { %2354 = vmatprep.subr.msk.bf16.mxu0 %vm1910_vm3, %v2700_v13 }
 0x6b4   :  { %2355 = vmatpush3.bf16.msk.msra.mxu0 %vm1910_vm3, %v2700_v13  ;;  %vm1925_vm3 = vmpackc.low %vm1534_vm2, %vm1533_vm1 }
 0x6b7   :  { %2357 = vmatmul.mubr.bf16.vlgmr.msra.gmra.mrb[24].mxu0 %v3170_v35 }
 0x6b8   :  { %2360 = vmatprep.mubr.bf16.mxu0 %v3176_v36 }
 0x6bf   :  { %2361 = vmatmul.mubr.bf16.gmra.mrb[28].mxu0 %v2883_v28  ;;  %v61_v28 = vld [vmem:[%s3286_s3 + $0x20] sm:$0xff] }
 0x6c0   :  { %1660 = vperm.xlu0 %2475, %v61_v28  }
 0x6c4   :  { %1670 = vperm.xlu0 %2475, %v63_v42  }
 0x6c8   :  { %1711 = vperm.xlu0 %2475, %v1708_v44  }
 0x73f   :  { %v1661_v63 = vpop.permute.xlu0 %1660 }
 0x743   :  { %v1671_v39 = vpop.permute.xlu0 %1670 }
 0x78a   :  { %v2358_v45 = vpop.f32.mrb[24].mxu0 }
 0x78b   :  { %2581 = vtanh.f32 %v2358_v45  ;;  %v1411_v46 = vpop.f32.mrb[25].mxu0 }
 0x78c   :  { %2583 = vtanh.f32 %v1411_v46  ;;  %v2359_v47 = vpop.f32.mrb[26].mxu0 }
 0x78d   :  { %2585 = vtanh.f32 %v2359_v47  ;;  %v1414_v48 = vpop.f32.mrb[27].mxu0 }
 0x78e   :  { %2587 = vtanh.f32 %v1414_v48 }
 0x792   :  { %v2362_v49 = vpop.f32.mrb[28].mxu0 }
 0x793   :  { %2589 = vtanh.f32 %v2362_v49  ;;  %v1427_v50 = vpop.f32.mrb[29].mxu0 }
 0x794   :  { %2591 = vtanh.f32 %v1427_v50  ;;  %v2363_v51 = vpop.f32.mrb[30].mxu0 }
 0x795   :  { %v2582_v52 = vpop.eup %2581  ;;  %2593 = vtanh.f32 %v2363_v51  ;;  %v1430_v53 = vpop.f32.mrb[31].mxu0 }
 0x796   :  { %v2584_v54 = vpop.eup %2583  ;;  %2595 = vtanh.f32 %v1430_v53 }
 0x797   :  { %v2586_v55 = vpop.eup %2585 }
 0x798   :  { %v2588_v11 = vpop.eup %2587  ;;  %v1451_v12 = vpack.c.bf16 %v2586_v55, %v2582_v52 }
 0x799   :  { %v1450_v18 = vpack.c.bf16 %v2588_v11, %v2584_v54  ;;  %v1716_v54 = vsub.s32 0, %v2753_v3  ;;  %v1712_v11 = vpop.permute.xlu0 %1711 }
 0x79b   :  { %2364 = vmatprep.subr.bf16.mxu1 %v1450_v18 }
 0x79c   :  { %2365 = vmatpush3.bf16.msra.mxu1 %v1450_v18  ;;  %v1717_v18 = vrot.slane %v1712_v11, %v1716_v54 }
 0x79d   :  { %v2590_v19 = vpop.eup %2589  ;;  %2366 = vmatprep.subr.bf16.mxu1 %v1451_v12 }
 0x79e   :  { %v2592_v56 = vpop.eup %2591 }
 0x79f   :  { %v2594_v57 = vpop.eup %2593 }
 0x7a0   :  { %v2596_v26 = vpop.eup %2595  ;;  %2367 = vmatpush3.bf16.msra.mxu1 %v1451_v12  ;;  %v1453_v58 = vpack.c.bf16 %v2594_v57, %v2590_v19 }
 0x7a1   :  { %v1452_v59 = vpack.c.bf16 %v2596_v26, %v2592_v56 }
 0x7a3   :  { %2368 = vmatprep.subr.bf16.mxu1 %v1452_v59 }
 0x7a4   :  { %2369 = vmatpush3.bf16.msra.mxu1 %v1452_v59 }
 0x7a5   :  { %2370 = vmatprep.subr.bf16.mxu1 %v1453_v58 }
 0x7a8   :  { %2371 = vmatpush3.bf16.msra.mxu1 %v1453_v58 }
 0x7a9   :  { %2380 = vmatprep.subr.msk.bf16.mxu1 %vm1917_vm6, %v2700_v13 }
 0x7ab   :  { %2373 = vmatmul.mubr.msk.bf16.vlgmr.msra.gmra.mrb[24].mxu1 %vm102_vm0, %v3116_v31 }
 0x7ac   :  { %2381 = vmatpush3.bf16.msk.msra.mxu1 %vm1917_vm6, %v2700_v13  ;;  %2376 = vmatprep.mubr.msk.bf16.mxu1 %vm102_vm0, %v3126_v32  ;;  %vm1927_vm6 = vmpackc.low %vm1536_vm5, %vm1535_vm4 }
 0x7ad   :  { %2382 = vmatprep.subr.msk.bf16.mxu1 %vm1919_vm9, %v2700_v13 }
 0x7b0   :  { %2383 = vmatpush3.bf16.msk.msra.mxu1 %vm1919_vm9, %v2700_v13  ;;  %vm1539_vm9 = vcmp.eq.s32.totalorder %v2854_v24, %v1916_v27  ;;  %v1656_v24 = vpop.permute.xlu1 %1655 }
 0x7b1   :  { %2384 = vmatprep.subr.msk.bf16.mxu1 %vm1921_vm12, %v2700_v13  ;;  %vm1931_vm11 = vmpackc.low %vm1540_vm10, %vm1539_vm9 }
 0x7b3   :  { %2377 = vmatmul.mubr.msk.bf16.gmra.mrb[28].mxu1 %vm102_vm0, %v3140_v33  ;;  %vm1538_vm0 = vcmp.eq.s32.totalorder %v2847_v23, %v1916_v27 }
 0x7b4   :  { %2385 = vmatpush3.bf16.msk.msra.mxu1 %vm1921_vm12, %v2700_v13  ;;  %2396 = vmatprep.mubr.bf16.mxu1 %v3148_v34  ;;  %vm1929_vm8 = vmpackc.low %vm1538_vm0, %vm1537_vm7  ;;  %vm1686_vm12 = vcmask 64512   ;;  %v1666_v29 = vpop.permute.xlu1 %1665 }
 0x7b5   :  { %2386 = vmatprep.subr.msk.bf16.mxu1 %vm1923_vm15, %v2700_v13 }
 0x7b8   :  { %2387 = vmatpush3.bf16.msk.msra.mxu1 %vm1923_vm15, %v2700_v13  ;;  %v1676_v42 = vpop.permute.xlu1 %1675 }
 0x7b9   :  { %2388 = vmatprep.subr.msk.bf16.mxu1 %vm1925_vm3, %v2700_v13 }
 0x7bc   :  { %2389 = vmatpush3.bf16.msk.msra.mxu1 %vm1925_vm3, %v2700_v13 }
 0x7bd   :  { %2390 = vmatprep.subr.msk.bf16.mxu1 %vm1927_vm6, %v2700_v13 }
 0x7c0   :  { %2391 = vmatpush3.bf16.msk.msra.mxu1 %vm1927_vm6, %v2700_v13 }
 0x7c1   :  { %2392 = vmatprep.subr.msk.bf16.mxu1 %vm1929_vm8, %v2700_v13 }
 0x7c4   :  { %2393 = vmatpush3.bf16.msk.msra.mxu1 %vm1929_vm8, %v2700_v13 }
 0x7c5   :  { %2394 = vmatprep.subr.msk.bf16.mxu1 %vm1931_vm11, %v2700_v13 }
 0x7c8   :  { %2395 = vmatpush3.bf16.msk.msra.mxu1 %vm1931_vm11, %v2700_v13 }
 0x7cb   :  { %2397 = vmatmul.mubr.bf16.vlgmr.msra.gmra.mrb[24].mxu1 %v3170_v35 }
 0x7cc   :  { %2400 = vmatprep.mubr.bf16.mxu1 %v3176_v36 }
 0x7d3   :  { %2401 = vmatmul.mubr.bf16.gmra.mrb[28].mxu1 %v2623_v4 }
 0x89e   :  { %v2398_v5 = vpop.f32.mrb[24].mxu1 }
 0x89f   :  { %2597 = vtanh.f32 %v2398_v5  ;;  %v1599_v6 = vpop.f32.mrb[25].mxu1 }
 0x8a0   :  { %2599 = vtanh.f32 %v1599_v6  ;;  %v2399_v7 = vpop.f32.mrb[26].mxu1 }
 0x8a1   :  { %2601 = vtanh.f32 %v2399_v7  ;;  %v1602_v9 = vpop.f32.mrb[27].mxu1 }
 0x8a2   :  { %2603 = vtanh.f32 %v1602_v9 }
 0x8a6   :  { %v2402_v13 = vpop.f32.mrb[28].mxu1 }
 0x8a7   :  { %2605 = vtanh.f32 %v2402_v13  ;;  %v1615_v16 = vpop.f32.mrb[29].mxu1 }
 0x8a8   :  { %2607 = vtanh.f32 %v1615_v16  ;;  %v2403_v20 = vpop.f32.mrb[30].mxu1 }
 0x8a9   :  { %v2598_v21 = vpop.eup %2597  ;;  %2609 = vtanh.f32 %v2403_v20  ;;  %v1618_v22 = vpop.f32.mrb[31].mxu1 }
 0x8aa   :  { %v2600_v23 = vpop.eup %2599  ;;  %2611 = vtanh.f32 %v1618_v22  ;;  %v1680_v61 = vmul.f32 %v2598_v21, %v1651_v15 }
 0x8ab   :  { %v2602_v25 = vpop.eup %2601  ;;  %v1678_v60 = vmul.f32 %v2600_v23, %v1641_v14 }
 0x8ac   :  { %v2604_v8 = vpop.eup %2603  ;;  %v1681_v0 = vmul.f32 %v2602_v25, %v1656_v24  ;;  %v1690_v31 = vsel %vm1686_vm12, %v1680_v61, 0.0 }
 0x8ad   :  { %v1679_v62 = vmul.f32 %v2604_v8, %v1646_v17  ;;  %v1687_v1 = vsel %vm1686_vm12, %v1678_v60, 0.0 }
 0x8ae   :  { %v1692_v35 = vsel %vm1686_vm12, %v1681_v0, 0.0 }
 0x8af   :  { %v1688_v2 = vsel %vm1686_vm12, %v1679_v62, 0.0 }
 0x8b0   :  { %v1689_v10 = vadd.f32 %v1688_v2, %v1687_v1 }
 0x8b1   :  { %v2606_v30 = vpop.eup %2605 }
 0x8b2   :  { %v2608_v32 = vpop.eup %2607  ;;  %v1691_v33 = vadd.f32 %v1690_v31, %v1689_v10  ;;  %v1684_v28 = vmul.f32 %v2606_v30, %v1671_v39 }
 0x8b3   :  { %v2610_v34 = vpop.eup %2609  ;;  %v1682_v36 = vmul.f32 %v2608_v32, %v1661_v63 }
 0x8b4   :  { %v2612_v37 = vpop.eup %2611  ;;  %v1693_v38 = vadd.f32 %v1692_v35, %v1691_v33  ;;  %v1685_v44 = vmul.f32 %v2610_v34, %v1676_v42  ;;  %v1698_v47 = vsel %vm1686_vm12, %v1684_v28, 0.0 }
 0x8b5   :  { %v1683_v40 = vmul.f32 %v2612_v37, %v1666_v29  ;;  %v1694_v41 = vsel %vm1686_vm12, %v1682_v36, 0.0 }
 0x8b6   :  { %v1695_v43 = vadd.f32 %v1694_v41, %v1693_v38  ;;  %v1700_v49 = vsel %vm1686_vm12, %v1685_v44, 0.0 }
 0x8b7   :  { %v1696_v45 = vsel %vm1686_vm12, %v1683_v40, 0.0 }
 0x8b8   :  { %v1697_v46 = vadd.f32 %v1696_v45, %v1695_v43 }
 0x8ba   :  { %v1699_v48 = vadd.f32 %v1698_v47, %v1697_v46 }
 0x8bc   :  { %v1701_v50 = vadd.f32 %v1700_v49, %v1699_v48 }
 0x8be   :  { %v1702_v51 = vrot.slane %v1701_v50, 4 }
 0x8c0   :  { %v1703_v52 = vadd.f32 %v1702_v51, %v1701_v50 }
 0x8c2   :  { %v1704_v53 = vrot.slane %v1703_v52, 2 }
 0x8c4   :  { %v1705_v55 = vadd.f32 %v1704_v53, %v1703_v52 }
 0x8c6   :  { %v1706_v12 = vrot.slane %v1705_v55, 1 }
 0x8c8   :  { %v1707_v19 = vadd.f32 %v1706_v12, %v1705_v55 }
 0x8ca   :  { %v1718_v56 = vadd.f32 %v1717_v18, %v1707_v19 }
 0x8cc   :  { %v1719_v57 = vsub.f32 %v1718_v56, %v1718_v56  ;;  %1727 = vst.msk [vmem:[#allocation7] sm:$0x1] %vm1725_vm13, %v1718_v56 }
 0x8cd   :  { %2657 = shalt.err (!%p2654_p12)
}
 0x8ce   :  { %s2658_s9 = scalar_lea.hbm %s3289_s6, 16 }
 0x8cf   :  { %p2659_p13 = scmp.ne.s32.totalorder %s3289_s6, %s2658_s9  ;;  %p2662_p0 = scmp.lt.u32.totalorder %s2658_s9, %s3289_s6 }
 0x8d1   :  { %p2664_p1 = pnand %p2662_p0, %p2659_p13 }
 0x8d3   :  { %2667 = shalt.err (!%p2664_p1)
}
 0x8d4   :  { %1747 = dma.vmem_to_hbm [thread:$0]  %s1745_s29, 16, %s3289_s6, [#allocation8]   ;;  %v1720_v3 = vmul.f32 1.442695, %v1719_v57 }
 0x8d5   :  { %s2702_s14 = smov [#allocation6]  }
 0x8d6   :  { %2613 = vpow2.f32 %v1720_v3  ;;  %s1734_s15 = sshll.u32 %s2702_s14, 4  ;;  %s1735_s15 = int_to_ptr.vmem [resolvable:$true] %s1734_s15 }
 0x8d7   :  { %s2668_s16 = scalar_lea.vmem %s1735_s15, 16  ;;  %s2672_s17 = scalar_lea.vmem %s1735_s15, 32 }
 0x8d8   :  { %p2669_p2 = scmp.ne.s32.totalorder %s1735_s15, %s2668_s16  ;;  %p2673_p3 = scmp.lt.s32.totalorder %s1735_s15, %s1735_s15 }
 0x8d9   :  { %p2674_p4 = scmp.lt.s32.totalorder %s2672_s17, %s2668_s16 }
 0x8db   :  { %p2675_p5 = por %p2674_p4, %p2673_p3 }
 0x8dd   :  { %p2676_p6 = pnand %p2675_p5, %p2669_p2 }
 0x8e0   :  { %v2614_v26 = vpop.eup %2613 }
 0x8e1   :  { %2615 = vrcp.f32 %v2614_v26 }
 0x8eb   :  { %v2616_v58 = vpop.eup %2615 }
 0x8ec   :  { %v1724_v27 = vmul.f32 %v2616_v58, %v2614_v26 }
 0x8ee   :  { %1726 = vst.msk [vmem:[#allocation6] sm:$0x1] %vm1725_vm13, %v1724_v27 }
 0x8ef   :  { %2679 = shalt.err (!%p2676_p6)
}
 0x8f0   :  { %s2680_s19 = scalar_lea.hbm %s3288_s5, 16 }
 0x8f1   :  { %p2681_p7 = scmp.ne.s32.totalorder %s3288_s5, %s2680_s19  ;;  %p2684_p8 = scmp.lt.u32.totalorder %s2680_s19, %s3288_s5 }
 0x8f3   :  { %p2686_p9 = pnand %p2684_p8, %p2681_p7 }
 0x8f5   :  { %2689 = shalt.err (!%p2686_p9)
}
 0x8f6   :  { %1737 = dma.vmem_to_hbm [thread:$0]  %s1735_s15, 16, %s3288_s5, [#allocation5]  }
 0x8f7   :  { %2692 = dma.done.wait [#allocation5], 16  }
 0x8f8   :  { %2693 = vsyncadd [#allocation5], 4294967280 }
 0x8f9   :  { %2694 = dma.done.wait [#allocation8], 16  }
 0x8fa   :  { %2695 = vsyncadd [#allocation8], 4294967280 }
 0x8fb   :  { %1754 = vsyncpa [#allocation4], 1 }
 0x8fc   :  { %1755 = vsyncpa [#allocation5], 1 }
 0x8fd   :  { %1756 = vsyncpa [#allocation8], 1 }

</bundles_post_ra>
